<compile_context>
chip_gen: v5e
topology: v5e:2x2
jax: 0.10.0
libtpu: 0.0.40
codegen_flags: <defaults>
</compile_context>

<pallas_src>
import jax
import jax.numpy as jnp
import numpy as np
from jax.experimental import pallas as pl
from jax.experimental.pallas import tpu as pltpu

# ----------------------- model hyper-parameters (small) -----------------------
NTOKEN = 50
NINP = 16
NHID = 32
NLAYERS = 2          # kernel below is specialized for 2 layers (as in the spec)
SEQ = 8
BATCH = 4

V_PAD = 128          # vocab padded 50 -> 128 for a lane-dense one-hot / decoder matmul
G = 4 * NHID         # 128: fused-gate width == one full vreg lane dim
HIGHEST = jax.lax.Precision.HIGHEST


# ------------------------------ fused kernel -----------------------------------
def fused_rnn_kernel(tok_ref, w0f_ref, b0_ref,
                     whh0_ref, wih1_ref, whh1_ref, b1_ref,
                     dec_w_ref, dec_b_ref,
                     h0_ref, c0_ref,
                     dec_out_ref, hT_ref, cT_ref):
    """Embedding + 2-layer LSTM (time loop unrolled inside) + decoder, one shot."""
    SB = SEQ * BATCH
    H = NHID

    # ---- Embedding + layer-0 input projection as ONE one-hot MXU matmul ----
    # onehot(tok) @ (enc_w @ W_ih0^T) + b0 for ALL timesteps (off the serial path).
    tok = tok_ref[...]                                               # (SB, 1) int32
    vocab_iota = jax.lax.broadcasted_iota(jnp.int32, (SB, V_PAD), 1)
    onehot = (tok == vocab_iota).astype(jnp.float32)                 # (SB, V_PAD)
    xproj0 = jnp.dot(onehot, w0f_ref[...],
                     preferred_element_type=jnp.float32) + b0_ref[...]   # (SB, G)

    # Hoisted loop invariants (weights live in vregs; broadcasts emitted once).
    whh0 = whh0_ref[...]
    wih1 = wih1_ref[...]
    whh1 = whh1_ref[...]
    dec_w = dec_w_ref[...]
    b1 = jnp.broadcast_to(b1_ref[...], (BATCH, G))
    dec_b = jnp.broadcast_to(dec_b_ref[...], (BATCH, V_PAD))

    # Per-lane constants for the single-EUP-pass activation:
    # tanh(x) = 2*sigmoid(2x) - 1 applied only on the 'g' gate lanes.
    lane = jax.lax.broadcasted_iota(jnp.int32, (BATCH, G), 1)
    is_g = (lane >= 2 * H) & (lane < 3 * H)
    gate_scale = jnp.where(is_g, 2.0, 1.0)
    gate_shift = jnp.where(is_g, 1.0, 0.0)

    h0 = h0_ref[0]
    c0 = c0_ref[0]
    h1 = h0_ref[1]
    c1 = c0_ref[1]

    def lstm_cell(gates, c_prev):
        # ONE full-vreg sigmoid on the EUP; g-lanes fixed up with cheap VPU FMAs.
        s = jax.nn.sigmoid(gates * gate_scale)
        act = s * gate_scale - gate_shift            # i,f,o: sigmoid(g); g: tanh(g)
        i_g = act[:, 0 * H:1 * H]
        f_g = act[:, 1 * H:2 * H]
        g_g = act[:, 2 * H:3 * H]
        o_g = act[:, 3 * H:4 * H]
        c_new = f_g * c_prev + i_g * g_g
        h_new = o_g * jnp.tanh(c_new)
        return h_new, c_new

    # Fully unrolled, statically indexed time loop (SEQ is small and fixed).
    # Only two MXU visits per step sit on the serial dependency chain; rec1 and
    # the decoder matmul depend only on previous-step state and fill MXU gaps.
    for t in range(SEQ):
        r0 = t * BATCH
        rec1 = jnp.dot(h1, whh1, preferred_element_type=jnp.float32)      # off-chain
        g0 = xproj0[r0:r0 + BATCH, :] + jnp.dot(
            h0, whh0, preferred_element_type=jnp.float32)
        h0, c0 = lstm_cell(g0, c0)
        g1 = jnp.dot(h0, wih1, preferred_element_type=jnp.float32) + rec1 + b1
        h1, c1 = lstm_cell(g1, c1)
        # Decoder for this timestep: lane-dense (BATCH, 128) matmul, then store the
        # 50 real vocab lanes straight into the (SEQ, BATCH, NTOKEN) output
        # (no VMEM scratch round-trip, no wrapper-side slice).
        dec_t = jnp.dot(h1, dec_w, preferred_element_type=jnp.float32) + dec_b
        dec_out_ref[t] = dec_t[:, :NTOKEN]

    hT_ref[0] = h0
    hT_ref[1] = h1
    cT_ref[0] = c0
    cT_ref[1] = c1


# ----------------------------- wrapper / forward --------------------------------
@jax.jit
def rnn_model_forward(pp, tokens, hidden):
    """pp: prepared params; tokens: (SEQ, BATCH) int32; hidden: ((L,B,H),(L,B,H))."""
    S, B = tokens.shape
    h0, c0 = hidden
    # Contiguous row-major reshape: metadata only, no XLA pad/copy kernels.
    tok_flat = tokens.reshape(S * B, 1)

    vmem = pl.BlockSpec(memory_space=pltpu.MemorySpace.VMEM)
    decoded, hT, cT = pl.pallas_call(
        fused_rnn_kernel,
        out_shape=(
            jax.ShapeDtypeStruct((S, B, NTOKEN), jnp.float32),     # decoded
            jax.ShapeDtypeStruct((NLAYERS, B, NHID), jnp.float32),  # h_T
            jax.ShapeDtypeStruct((NLAYERS, B, NHID), jnp.float32),  # c_T
        ),
        in_specs=[vmem] * 11,
        out_specs=(vmem, vmem, vmem),
    )(tok_flat, pp["w0_fused"], pp["b0"],
      pp["whh0_t"], pp["wih1_t"], pp["whh1_t"], pp["b1"],
      pp["dec_w_t_pad"], pp["dec_b_pad"],
      h0, c0)
    return decoded, (hT, cT)


# --------------------------- pure-JAX reference ---------------------------------
def ref_forward(params, tokens, hidden):
    x = jnp.take(params["enc_w"], tokens, axis=0)
    h0s, c0s = hidden
    hs, cs = [], []
    for l in range(NLAYERS):
        wih_t, whh_t, b = params["wih_t"][l], params["whh_t"][l], params["b"][l]

        def step(carry, x_t, wih_t=wih_t, whh_t=whh_t, b=b):
            h, c = carry
            g = (jnp.dot(x_t, wih_t, precision=HIGHEST)
                 + jnp.dot(h, whh_t, precision=HIGHEST) + b)
            H = h.shape[-1]
            i = jax.nn.sigmoid(g[:, :H])
            f = jax.nn.sigmoid(g[:, H:2 * H])
            gg = jnp.tanh(g[:, 2 * H:3 * H])
            o = jax.nn.sigmoid(g[:, 3 * H:])
            c2 = f * c + i * gg
            h2 = o * jnp.tanh(c2)
            return (h2, c2), h2

        (hT, cT), y = jax.lax.scan(step, (h0s[l], c0s[l]), x)
        hs.append(hT)
        cs.append(cT)
        x = y
    S, B, H = x.shape
    dec = jnp.dot(x.reshape(S * B, H), params["dec_w_t"],
                  precision=HIGHEST) + params["dec_b"]
    return dec.reshape(S, B, -1), (jnp.stack(hs), jnp.stack(cs))


# ----------------------------- parameter init -----------------------------------
def init_params(key):
    ks = jax.random.split(key, 2 + 4 * NLAYERS)
    initrange = 0.1
    stdv = 1.0 / np.sqrt(NHID)                        # PyTorch LSTM default init
    params = {
        "enc_w": jax.random.uniform(ks[0], (NTOKEN, NINP), jnp.float32,
                                    -initrange, initrange),
        "dec_w_t": jax.random.uniform(ks[1], (NHID, NTOKEN), jnp.float32,
                                      -initrange, initrange),   # decoder weight^T
        "dec_b": jnp.zeros((1, NTOKEN), jnp.float32),
        "wih_t": [], "whh_t": [], "b": [],
    }
    for l in range(NLAYERS):
        din = NINP if l == 0 else NHID
        k0, k1, k2, k3 = ks[2 + 4 * l: 6 + 4 * l]
        wih = jax.random.uniform(k0, (4 * NHID, din), jnp.float32, -stdv, stdv)
        whh = jax.random.uniform(k1, (4 * NHID, NHID), jnp.float32, -stdv, stdv)
        bih = jax.random.uniform(k2, (4 * NHID,), jnp.float32, -stdv, stdv)
        bhh = jax.random.uniform(k3, (4 * NHID,), jnp.float32, -stdv, stdv)
        params["wih_t"].append(wih.T)                 # (din, 4H)
        params["whh_t"].append(whh.T)                 # (H, 4H)
        params["b"].append((bih + bhh)[None, :])      # (1, 4H)
    return params


def pad_params(params):
    """One-time TPU-friendly preparation of parameters for the fused kernel."""
    enc_w_pad = (jnp.zeros((V_PAD, NINP), jnp.float32)
                 .at[:NTOKEN, :].set(params["enc_w"]))
    # Embedding + layer-0 input projection folded into ONE (V_PAD, 4H) weight.
    w0_fused = jnp.dot(enc_w_pad, params["wih_t"][0], precision=HIGHEST)
    return {
        "w0_fused": w0_fused,                                    # (128, 128)
        "b0": params["b"][0],                                    # (1, 128)
        "whh0_t": params["whh_t"][0],                            # (32, 128)
        "wih1_t": params["wih_t"][1],                            # (32, 128)
        "whh1_t": params["whh_t"][1],                            # (32, 128)
        "b1": params["b"][1],                                    # (1, 128)
        "dec_w_t_pad": (jnp.zeros((NHID, V_PAD), jnp.float32)
                        .at[:, :NTOKEN].set(params["dec_w_t"])),  # (32, 128)
        "dec_b_pad": (jnp.zeros((1, V_PAD), jnp.float32)
                      .at[:, :NTOKEN].set(params["dec_b"])),      # (1, 128)
    }


# ----------------------------------- main ----------------------------------------
if __name__ == "__main__":
    key = jax.random.PRNGKey(0)
    pkey, tkey = jax.random.split(key)
    params = init_params(pkey)
    pp = pad_params(params)

    tokens = jax.random.randint(tkey, (SEQ, BATCH), 0, NTOKEN, dtype=jnp.int32)
    hidden = (jnp.zeros((NLAYERS, BATCH, NHID), jnp.float32),
              jnp.zeros((NLAYERS, BATCH, NHID), jnp.float32))

    decoded, (hT, cT) = rnn_model_forward(pp, tokens, hidden)
    jax.block_until_ready(decoded)
    jax.block_until_ready(hT)
    jax.block_until_ready(cT)

    ref_dec, (ref_h, ref_c) = ref_forward(params, tokens, hidden)
    np.testing.assert_allclose(np.asarray(decoded), np.asarray(ref_dec),
                               rtol=5e-5, atol=5e-5)
    np.testing.assert_allclose(np.asarray(hT), np.asarray(ref_h),
                               rtol=5e-5, atol=5e-5)
    np.testing.assert_allclose(np.asarray(cT), np.asarray(ref_c),
                               rtol=5e-5, atol=5e-5)

    assert decoded.shape == (SEQ, BATCH, NTOKEN)
    assert hT.shape == (NLAYERS, BATCH, NHID) and cT.shape == (NLAYERS, BATCH, NHID)
    print("KERNEL_OK")
</pallas_src>

<mosaic_0001>
module attributes {stable_mosaic.version = 11 : i64} {
  func.func @fused_rnn_kernel(%arg0: memref<32x1xi32, #tpu.memory_space<vmem>>, %arg1: memref<128x128xf32, #tpu.memory_space<vmem>>, %arg2: memref<1x128xf32, #tpu.memory_space<vmem>>, %arg3: memref<32x128xf32, #tpu.memory_space<vmem>>, %arg4: memref<32x128xf32, #tpu.memory_space<vmem>>, %arg5: memref<32x128xf32, #tpu.memory_space<vmem>>, %arg6: memref<1x128xf32, #tpu.memory_space<vmem>>, %arg7: memref<32x128xf32, #tpu.memory_space<vmem>>, %arg8: memref<1x128xf32, #tpu.memory_space<vmem>>, %arg9: memref<2x4x32xf32, #tpu.memory_space<vmem>>, %arg10: memref<2x4x32xf32, #tpu.memory_space<vmem>>, %arg11: memref<8x4x50xf32, #tpu.memory_space<vmem>>, %arg12: memref<2x4x32xf32, #tpu.memory_space<vmem>>, %arg13: memref<2x4x32xf32, #tpu.memory_space<vmem>>) attributes {dimension_semantics = [], scalar_prefetch = 0 : i64, scratch_operands = 0 : i64, tpu.core_type = #tpu.core_type<tc>} {
    %c0 = arith.constant 0 : index
    %c0_0 = arith.constant 0 : index
    %0 = vector.load %arg0[%c0, %c0_0] : memref<32x1xi32, #tpu.memory_space<vmem>>, vector<32x1xi32>
    %1 = tpu.iota {dimensions = array<i32: 1>} : vector<32x128xi32>
    %2 = vector.broadcast %0 : vector<32x1xi32> to vector<32x128xi32>
    %3 = arith.cmpi eq, %2, %1 : vector<32x128xi32>
    %4 = arith.extui %3 : vector<32x128xi1> to vector<32x128xi32>
    %5 = arith.sitofp %4 : vector<32x128xi32> to vector<32x128xf32>
    %c0_1 = arith.constant 0 : index
    %c0_2 = arith.constant 0 : index
    %6 = vector.load %arg1[%c0_1, %c0_2] : memref<128x128xf32, #tpu.memory_space<vmem>>, vector<128x128xf32>
    %cst = arith.constant dense<0.000000e+00> : vector<32x128xf32>
    %7 = tpu.matmul %5, %6, %cst {dimension_numbers = #tpu.dot_dimension_numbers<[1], [0], [0], [1], [0, 0, 1, 1], [], []>} : vector<32x128xf32>, vector<128x128xf32>, vector<32x128xf32> -> vector<32x128xf32>
    %c0_3 = arith.constant 0 : index
    %c0_4 = arith.constant 0 : index
    %8 = vector.load %arg2[%c0_3, %c0_4] : memref<1x128xf32, #tpu.memory_space<vmem>>, vector<1x128xf32>
    %9 = vector.broadcast %8 : vector<1x128xf32> to vector<32x128xf32>
    %10 = arith.addf %7, %9 : vector<32x128xf32>
    %c0_5 = arith.constant 0 : index
    %c0_6 = arith.constant 0 : index
    %11 = vector.load %arg3[%c0_5, %c0_6] : memref<32x128xf32, #tpu.memory_space<vmem>>, vector<32x128xf32>
    %c0_7 = arith.constant 0 : index
    %c0_8 = arith.constant 0 : index
    %12 = vector.load %arg4[%c0_7, %c0_8] : memref<32x128xf32, #tpu.memory_space<vmem>>, vector<32x128xf32>
    %c0_9 = arith.constant 0 : index
    %c0_10 = arith.constant 0 : index
    %13 = vector.load %arg5[%c0_9, %c0_10] : memref<32x128xf32, #tpu.memory_space<vmem>>, vector<32x128xf32>
    %c0_11 = arith.constant 0 : index
    %c0_12 = arith.constant 0 : index
    %14 = vector.load %arg7[%c0_11, %c0_12] : memref<32x128xf32, #tpu.memory_space<vmem>>, vector<32x128xf32>
    %c0_13 = arith.constant 0 : index
    %c0_14 = arith.constant 0 : index
    %15 = vector.load %arg6[%c0_13, %c0_14] : memref<1x128xf32, #tpu.memory_space<vmem>>, vector<1x128xf32>
    %16 = vector.shape_cast %15 : vector<1x128xf32> to vector<1x128xf32>
    %17 = vector.broadcast %16 : vector<1x128xf32> to vector<4x128xf32>
    %c0_15 = arith.constant 0 : index
    %c0_16 = arith.constant 0 : index
    %18 = vector.load %arg8[%c0_15, %c0_16] : memref<1x128xf32, #tpu.memory_space<vmem>>, vector<1x128xf32>
    %19 = vector.shape_cast %18 : vector<1x128xf32> to vector<1x128xf32>
    %20 = vector.broadcast %19 : vector<1x128xf32> to vector<4x128xf32>
    %21 = tpu.iota {dimensions = array<i32: 1>} : vector<4x128xi32>
    %c64_i32 = arith.constant 64 : i32
    %22 = vector.broadcast %c64_i32 : i32 to vector<4x128xi32>
    %23 = arith.cmpi sge, %21, %22 : vector<4x128xi32>
    %c96_i32 = arith.constant 96 : i32
    %24 = vector.broadcast %c96_i32 : i32 to vector<4x128xi32>
    %25 = arith.cmpi slt, %21, %24 : vector<4x128xi32>
    %26 = arith.andi %23, %25 : vector<4x128xi1>
    %cst_17 = arith.constant 2.000000e+00 : f32
    %cst_18 = arith.constant 1.000000e+00 : f32
    %27 = vector.broadcast %cst_17 : f32 to vector<4x128xf32>
    %28 = vector.broadcast %cst_18 : f32 to vector<4x128xf32>
    %29 = arith.select %26, %27, %28 : vector<4x128xi1>, vector<4x128xf32>
    %cst_19 = arith.constant 1.000000e+00 : f32
    %cst_20 = arith.constant 0.000000e+00 : f32
    %30 = vector.broadcast %cst_19 : f32 to vector<4x128xf32>
    %31 = vector.broadcast %cst_20 : f32 to vector<4x128xf32>
    %32 = arith.select %26, %30, %31 : vector<4x128xi1>, vector<4x128xf32>
    %c0_21 = arith.constant 0 : index
    %c0_22 = arith.constant 0 : index
    %c0_23 = arith.constant 0 : index
    %33 = vector.load %arg9[%c0_21, %c0_22, %c0_23] : memref<2x4x32xf32, #tpu.memory_space<vmem>>, vector<1x4x32xf32>
    %34 = vector.shape_cast %33 : vector<1x4x32xf32> to vector<4x32xf32>
    %c0_24 = arith.constant 0 : index
    %c0_25 = arith.constant 0 : index
    %c0_26 = arith.constant 0 : index
    %35 = vector.load %arg10[%c0_24, %c0_25, %c0_26] : memref<2x4x32xf32, #tpu.memory_space<vmem>>, vector<1x4x32xf32>
    %36 = vector.shape_cast %35 : vector<1x4x32xf32> to vector<4x32xf32>
    %c1 = arith.constant 1 : index
    %c0_27 = arith.constant 0 : index
    %c0_28 = arith.constant 0 : index
    %37 = vector.load %arg9[%c1, %c0_27, %c0_28] : memref<2x4x32xf32, #tpu.memory_space<vmem>>, vector<1x4x32xf32>
    %38 = vector.shape_cast %37 : vector<1x4x32xf32> to vector<4x32xf32>
    %c1_29 = arith.constant 1 : index
    %c0_30 = arith.constant 0 : index
    %c0_31 = arith.constant 0 : index
    %39 = vector.load %arg10[%c1_29, %c0_30, %c0_31] : memref<2x4x32xf32, #tpu.memory_space<vmem>>, vector<1x4x32xf32>
    %40 = vector.shape_cast %39 : vector<1x4x32xf32> to vector<4x32xf32>
    %cst_32 = arith.constant dense<0.000000e+00> : vector<4x128xf32>
    %41 = tpu.matmul %38, %13, %cst_32 {dimension_numbers = #tpu.dot_dimension_numbers<[1], [0], [0], [1], [0, 0, 1, 1], [], []>} : vector<4x32xf32>, vector<32x128xf32>, vector<4x128xf32> -> vector<4x128xf32>
    %42 = vector.extract_strided_slice %10 {offsets = [0, 0], sizes = [4, 128], strides = [1, 1]} : vector<32x128xf32> to vector<4x128xf32>
    %cst_33 = arith.constant dense<0.000000e+00> : vector<4x128xf32>
    %43 = tpu.matmul %34, %11, %cst_33 {dimension_numbers = #tpu.dot_dimension_numbers<[1], [0], [0], [1], [0, 0, 1, 1], [], []>} : vector<4x32xf32>, vector<32x128xf32>, vector<4x128xf32> -> vector<4x128xf32>
    %44 = arith.addf %42, %43 : vector<4x128xf32>
    %45 = arith.mulf %44, %29 : vector<4x128xf32>
    %46 = arith.negf %45 : vector<4x128xf32>
    %47 = math.exp %46 : vector<4x128xf32>
    %cst_34 = arith.constant 1.000000e+00 : f32
    %48 = vector.broadcast %cst_34 : f32 to vector<4x128xf32>
    %49 = arith.addf %48, %47 : vector<4x128xf32>
    %50 = arith.divf %48, %49 : vector<4x128xf32>
    %51 = arith.mulf %50, %29 : vector<4x128xf32>
    %52 = arith.subf %51, %32 : vector<4x128xf32>
    %53 = vector.extract_strided_slice %52 {offsets = [0, 0], sizes = [4, 32], strides = [1, 1]} : vector<4x128xf32> to vector<4x32xf32>
    %54 = vector.extract_strided_slice %52 {offsets = [0, 32], sizes = [4, 32], strides = [1, 1]} : vector<4x128xf32> to vector<4x32xf32>
    %55 = vector.extract_strided_slice %52 {offsets = [0, 64], sizes = [4, 32], strides = [1, 1]} : vector<4x128xf32> to vector<4x32xf32>
    %56 = vector.extract_strided_slice %52 {offsets = [0, 96], sizes = [4, 32], strides = [1, 1]} : vector<4x128xf32> to vector<4x32xf32>
    %57 = arith.mulf %54, %36 : vector<4x32xf32>
    %58 = arith.mulf %53, %55 : vector<4x32xf32>
    %59 = arith.addf %57, %58 : vector<4x32xf32>
    %60 = math.tanh %59 : vector<4x32xf32>
    %61 = arith.mulf %56, %60 : vector<4x32xf32>
    %cst_35 = arith.constant dense<0.000000e+00> : vector<4x128xf32>
    %62 = tpu.matmul %61, %12, %cst_35 {dimension_numbers = #tpu.dot_dimension_numbers<[1], [0], [0], [1], [0, 0, 1, 1], [], []>} : vector<4x32xf32>, vector<32x128xf32>, vector<4x128xf32> -> vector<4x128xf32>
    %63 = arith.addf %62, %41 : vector<4x128xf32>
    %64 = arith.addf %63, %17 : vector<4x128xf32>
    %65 = arith.mulf %64, %29 : vector<4x128xf32>
    %66 = arith.negf %65 : vector<4x128xf32>
    %67 = math.exp %66 : vector<4x128xf32>
    %cst_36 = arith.constant 1.000000e+00 : f32
    %68 = vector.broadcast %cst_36 : f32 to vector<4x128xf32>
    %69 = arith.addf %68, %67 : vector<4x128xf32>
    %70 = arith.divf %68, %69 : vector<4x128xf32>
    %71 = arith.mulf %70, %29 : vector<4x128xf32>
    %72 = arith.subf %71, %32 : vector<4x128xf32>
    %73 = vector.extract_strided_slice %72 {offsets = [0, 0], sizes = [4, 32], strides = [1, 1]} : vector<4x128xf32> to vector<4x32xf32>
    %74 = vector.extract_strided_slice %72 {offsets = [0, 32], sizes = [4, 32], strides = [1, 1]} : vector<4x128xf32> to vector<4x32xf32>
    %75 = vector.extract_strided_slice %72 {offsets = [0, 64], sizes = [4, 32], strides = [1, 1]} : vector<4x128xf32> to vector<4x32xf32>
    %76 = vector.extract_strided_slice %72 {offsets = [0, 96], sizes = [4, 32], strides = [1, 1]} : vector<4x128xf32> to vector<4x32xf32>
    %77 = arith.mulf %74, %40 : vector<4x32xf32>
    %78 = arith.mulf %73, %75 : vector<4x32xf32>
    %79 = arith.addf %77, %78 : vector<4x32xf32>
    %80 = math.tanh %79 : vector<4x32xf32>
    %81 = arith.mulf %76, %80 : vector<4x32xf32>
    %cst_37 = arith.constant dense<0.000000e+00> : vector<4x128xf32>
    %82 = tpu.matmul %81, %14, %cst_37 {dimension_numbers = #tpu.dot_dimension_numbers<[1], [0], [0], [1], [0, 0, 1, 1], [], []>} : vector<4x32xf32>, vector<32x128xf32>, vector<4x128xf32> -> vector<4x128xf32>
    %83 = arith.addf %82, %20 : vector<4x128xf32>
    %84 = vector.extract_strided_slice %83 {offsets = [0, 0], sizes = [4, 50], strides = [1, 1]} : vector<4x128xf32> to vector<4x50xf32>
    %c0_38 = arith.constant 0 : index
    %c0_39 = arith.constant 0 : index
    %c0_40 = arith.constant 0 : index
    %85 = vector.load %arg11[%c0_38, %c0_39, %c0_40] : memref<8x4x50xf32, #tpu.memory_space<vmem>>, vector<1x4x50xf32>
    %86 = vector.shape_cast %85 : vector<1x4x50xf32> to vector<4x50xf32>
    %87 = vector.shape_cast %84 : vector<4x50xf32> to vector<1x4x50xf32>
    tpu.vector_store %arg11[%c0_38, %c0_39, %c0_40], %87 {strides = array<i32>} : memref<8x4x50xf32, #tpu.memory_space<vmem>>, vector<1x4x50xf32>,
    %cst_41 = arith.constant dense<0.000000e+00> : vector<4x128xf32>
    %88 = tpu.matmul %81, %13, %cst_41 {dimension_numbers = #tpu.dot_dimension_numbers<[1], [0], [0], [1], [0, 0, 1, 1], [], []>} : vector<4x32xf32>, vector<32x128xf32>, vector<4x128xf32> -> vector<4x128xf32>
    %89 = vector.extract_strided_slice %10 {offsets = [4, 0], sizes = [4, 128], strides = [1, 1]} : vector<32x128xf32> to vector<4x128xf32>
    %cst_42 = arith.constant dense<0.000000e+00> : vector<4x128xf32>
    %90 = tpu.matmul %61, %11, %cst_42 {dimension_numbers = #tpu.dot_dimension_numbers<[1], [0], [0], [1], [0, 0, 1, 1], [], []>} : vector<4x32xf32>, vector<32x128xf32>, vector<4x128xf32> -> vector<4x128xf32>
    %91 = arith.addf %89, %90 : vector<4x128xf32>
    %92 = arith.mulf %91, %29 : vector<4x128xf32>
    %93 = arith.negf %92 : vector<4x128xf32>
    %94 = math.exp %93 : vector<4x128xf32>
    %cst_43 = arith.constant 1.000000e+00 : f32
    %95 = vector.broadcast %cst_43 : f32 to vector<4x128xf32>
    %96 = arith.addf %95, %94 : vector<4x128xf32>
    %97 = arith.divf %95, %96 : vector<4x128xf32>
    %98 = arith.mulf %97, %29 : vector<4x128xf32>
    %99 = arith.subf %98, %32 : vector<4x128xf32>
    %100 = vector.extract_strided_slice %99 {offsets = [0, 0], sizes = [4, 32], strides = [1, 1]} : vector<4x128xf32> to vector<4x32xf32>
    %101 = vector.extract_strided_slice %99 {offsets = [0, 32], sizes = [4, 32], strides = [1, 1]} : vector<4x128xf32> to vector<4x32xf32>
    %102 = vector.extract_strided_slice %99 {offsets = [0, 64], sizes = [4, 32], strides = [1, 1]} : vector<4x128xf32> to vector<4x32xf32>
    %103 = vector.extract_strided_slice %99 {offsets = [0, 96], sizes = [4, 32], strides = [1, 1]} : vector<4x128xf32> to vector<4x32xf32>
    %104 = arith.mulf %101, %59 : vector<4x32xf32>
    %105 = arith.mulf %100, %102 : vector<4x32xf32>
    %106 = arith.addf %104, %105 : vector<4x32xf32>
    %107 = math.tanh %106 : vector<4x32xf32>
    %108 = arith.mulf %103, %107 : vector<4x32xf32>
    %cst_44 = arith.constant dense<0.000000e+00> : vector<4x128xf32>
    %109 = tpu.matmul %108, %12, %cst_44 {dimension_numbers = #tpu.dot_dimension_numbers<[1], [0], [0], [1], [0, 0, 1, 1], [], []>} : vector<4x32xf32>, vector<32x128xf32>, vector<4x128xf32> -> vector<4x128xf32>
    %110 = arith.addf %109, %88 : vector<4x128xf32>
    %111 = arith.addf %110, %17 : vector<4x128xf32>
    %112 = arith.mulf %111, %29 : vector<4x128xf32>
    %113 = arith.negf %112 : vector<4x128xf32>
    %114 = math.exp %113 : vector<4x128xf32>
    %cst_45 = arith.constant 1.000000e+00 : f32
    %115 = vector.broadcast %cst_45 : f32 to vector<4x128xf32>
    %116 = arith.addf %115, %114 : vector<4x128xf32>
    %117 = arith.divf %115, %116 : vector<4x128xf32>
    %118 = arith.mulf %117, %29 : vector<4x128xf32>
    %119 = arith.subf %118, %32 : vector<4x128xf32>
    %120 = vector.extract_strided_slice %119 {offsets = [0, 0], sizes = [4, 32], strides = [1, 1]} : vector<4x128xf32> to vector<4x32xf32>
    %121 = vector.extract_strided_slice %119 {offsets = [0, 32], sizes = [4, 32], strides = [1, 1]} : vector<4x128xf32> to vector<4x32xf32>
    %122 = vector.extract_strided_slice %119 {offsets = [0, 64], sizes = [4, 32], strides = [1, 1]} : vector<4x128xf32> to vector<4x32xf32>
    %123 = vector.extract_strided_slice %119 {offsets = [0, 96], sizes = [4, 32], strides = [1, 1]} : vector<4x128xf32> to vector<4x32xf32>
    %124 = arith.mulf %121, %79 : vector<4x32xf32>
    %125 = arith.mulf %120, %122 : vector<4x32xf32>
    %126 = arith.addf %124, %125 : vector<4x32xf32>
    %127 = math.tanh %126 : vector<4x32xf32>
    %128 = arith.mulf %123, %127 : vector<4x32xf32>
    %cst_46 = arith.constant dense<0.000000e+00> : vector<4x128xf32>
    %129 = tpu.matmul %128, %14, %cst_46 {dimension_numbers = #tpu.dot_dimension_numbers<[1], [0], [0], [1], [0, 0, 1, 1], [], []>} : vector<4x32xf32>, vector<32x128xf32>, vector<4x128xf32> -> vector<4x128xf32>
    %130 = arith.addf %129, %20 : vector<4x128xf32>
    %131 = vector.extract_strided_slice %130 {offsets = [0, 0], sizes = [4, 50], strides = [1, 1]} : vector<4x128xf32> to vector<4x50xf32>
    %c1_47 = arith.constant 1 : index
    %c0_48 = arith.constant 0 : index
    %c0_49 = arith.constant 0 : index
    %132 = vector.load %arg11[%c1_47, %c0_48, %c0_49] : memref<8x4x50xf32, #tpu.memory_space<vmem>>, vector<1x4x50xf32>
    %133 = vector.shape_cast %132 : vector<1x4x50xf32> to vector<4x50xf32>
    %134 = vector.shape_cast %131 : vector<4x50xf32> to vector<1x4x50xf32>
    tpu.vector_store %arg11[%c1_47, %c0_48, %c0_49], %134 {strides = array<i32>} : memref<8x4x50xf32, #tpu.memory_space<vmem>>, vector<1x4x50xf32>,
    %cst_50 = arith.constant dense<0.000000e+00> : vector<4x128xf32>
    %135 = tpu.matmul %128, %13, %cst_50 {dimension_numbers = #tpu.dot_dimension_numbers<[1], [0], [0], [1], [0, 0, 1, 1], [], []>} : vector<4x32xf32>, vector<32x128xf32>, vector<4x128xf32> -> vector<4x128xf32>
    %136 = vector.extract_strided_slice %10 {offsets = [8, 0], sizes = [4, 128], strides = [1, 1]} : vector<32x128xf32> to vector<4x128xf32>
    %cst_51 = arith.constant dense<0.000000e+00> : vector<4x128xf32>
    %137 = tpu.matmul %108, %11, %cst_51 {dimension_numbers = #tpu.dot_dimension_numbers<[1], [0], [0], [1], [0, 0, 1, 1], [], []>} : vector<4x32xf32>, vector<32x128xf32>, vector<4x128xf32> -> vector<4x128xf32>
    %138 = arith.addf %136, %137 : vector<4x128xf32>
    %139 = arith.mulf %138, %29 : vector<4x128xf32>
    %140 = arith.negf %139 : vector<4x128xf32>
    %141 = math.exp %140 : vector<4x128xf32>
    %cst_52 = arith.constant 1.000000e+00 : f32
    %142 = vector.broadcast %cst_52 : f32 to vector<4x128xf32>
    %143 = arith.addf %142, %141 : vector<4x128xf32>
    %144 = arith.divf %142, %143 : vector<4x128xf32>
    %145 = arith.mulf %144, %29 : vector<4x128xf32>
    %146 = arith.subf %145, %32 : vector<4x128xf32>
    %147 = vector.extract_strided_slice %146 {offsets = [0, 0], sizes = [4, 32], strides = [1, 1]} : vector<4x128xf32> to vector<4x32xf32>
    %148 = vector.extract_strided_slice %146 {offsets = [0, 32], sizes = [4, 32], strides = [1, 1]} : vector<4x128xf32> to vector<4x32xf32>
    %149 = vector.extract_strided_slice %146 {offsets = [0, 64], sizes = [4, 32], strides = [1, 1]} : vector<4x128xf32> to vector<4x32xf32>
    %150 = vector.extract_strided_slice %146 {offsets = [0, 96], sizes = [4, 32], strides = [1, 1]} : vector<4x128xf32> to vector<4x32xf32>
    %151 = arith.mulf %148, %106 : vector<4x32xf32>
    %152 = arith.mulf %147, %149 : vector<4x32xf32>
    %153 = arith.addf %151, %152 : vector<4x32xf32>
    %154 = math.tanh %153 : vector<4x32xf32>
    %155 = arith.mulf %150, %154 : vector<4x32xf32>
    %cst_53 = arith.constant dense<0.000000e+00> : vector<4x128xf32>
    %156 = tpu.matmul %155, %12, %cst_53 {dimension_numbers = #tpu.dot_dimension_numbers<[1], [0], [0], [1], [0, 0, 1, 1], [], []>} : vector<4x32xf32>, vector<32x128xf32>, vector<4x128xf32> -> vector<4x128xf32>
    %157 = arith.addf %156, %135 : vector<4x128xf32>
    %158 = arith.addf %157, %17 : vector<4x128xf32>
    %159 = arith.mulf %158, %29 : vector<4x128xf32>
    %160 = arith.negf %159 : vector<4x128xf32>
    %161 = math.exp %160 : vector<4x128xf32>
    %cst_54 = arith.constant 1.000000e+00 : f32
    %162 = vector.broadcast %cst_54 : f32 to vector<4x128xf32>
    %163 = arith.addf %162, %161 : vector<4x128xf32>
    %164 = arith.divf %162, %163 : vector<4x128xf32>
    %165 = arith.mulf %164, %29 : vector<4x128xf32>
    %166 = arith.subf %165, %32 : vector<4x128xf32>
    %167 = vector.extract_strided_slice %166 {offsets = [0, 0], sizes = [4, 32], strides = [1, 1]} : vector<4x128xf32> to vector<4x32xf32>
    %168 = vector.extract_strided_slice %166 {offsets = [0, 32], sizes = [4, 32], strides = [1, 1]} : vector<4x128xf32> to vector<4x32xf32>
    %169 = vector.extract_strided_slice %166 {offsets = [0, 64], sizes = [4, 32], strides = [1, 1]} : vector<4x128xf32> to vector<4x32xf32>
    %170 = vector.extract_strided_slice %166 {offsets = [0, 96], sizes = [4, 32], strides = [1, 1]} : vector<4x128xf32> to vector<4x32xf32>
    %171 = arith.mulf %168, %126 : vector<4x32xf32>
    %172 = arith.mulf %167, %169 : vector<4x32xf32>
    %173 = arith.addf %171, %172 : vector<4x32xf32>
    %174 = math.tanh %173 : vector<4x32xf32>
    %175 = arith.mulf %170, %174 : vector<4x32xf32>
    %cst_55 = arith.constant dense<0.000000e+00> : vector<4x128xf32>
    %176 = tpu.matmul %175, %14, %cst_55 {dimension_numbers = #tpu.dot_dimension_numbers<[1], [0], [0], [1], [0, 0, 1, 1], [], []>} : vector<4x32xf32>, vector<32x128xf32>, vector<4x128xf32> -> vector<4x128xf32>
    %177 = arith.addf %176, %20 : vector<4x128xf32>
    %178 = vector.extract_strided_slice %177 {offsets = [0, 0], sizes = [4, 50], strides = [1, 1]} : vector<4x128xf32> to vector<4x50xf32>
    %c2 = arith.constant 2 : index
    %c0_56 = arith.constant 0 : index
    %c0_57 = arith.constant 0 : index
    %179 = vector.load %arg11[%c2, %c0_56, %c0_57] : memref<8x4x50xf32, #tpu.memory_space<vmem>>, vector<1x4x50xf32>
    %180 = vector.shape_cast %179 : vector<1x4x50xf32> to vector<4x50xf32>
    %181 = vector.shape_cast %178 : vector<4x50xf32> to vector<1x4x50xf32>
    tpu.vector_store %arg11[%c2, %c0_56, %c0_57], %181 {strides = array<i32>} : memref<8x4x50xf32, #tpu.memory_space<vmem>>, vector<1x4x50xf32>,
    %cst_58 = arith.constant dense<0.000000e+00> : vector<4x128xf32>
    %182 = tpu.matmul %175, %13, %cst_58 {dimension_numbers = #tpu.dot_dimension_numbers<[1], [0], [0], [1], [0, 0, 1, 1], [], []>} : vector<4x32xf32>, vector<32x128xf32>, vector<4x128xf32> -> vector<4x128xf32>
    %183 = vector.extract_strided_slice %10 {offsets = [12, 0], sizes = [4, 128], strides = [1, 1]} : vector<32x128xf32> to vector<4x128xf32>
    %cst_59 = arith.constant dense<0.000000e+00> : vector<4x128xf32>
    %184 = tpu.matmul %155, %11, %cst_59 {dimension_numbers = #tpu.dot_dimension_numbers<[1], [0], [0], [1], [0, 0, 1, 1], [], []>} : vector<4x32xf32>, vector<32x128xf32>, vector<4x128xf32> -> vector<4x128xf32>
    %185 = arith.addf %183, %184 : vector<4x128xf32>
    %186 = arith.mulf %185, %29 : vector<4x128xf32>
    %187 = arith.negf %186 : vector<4x128xf32>
    %188 = math.exp %187 : vector<4x128xf32>
    %cst_60 = arith.constant 1.000000e+00 : f32
    %189 = vector.broadcast %cst_60 : f32 to vector<4x128xf32>
    %190 = arith.addf %189, %188 : vector<4x128xf32>
    %191 = arith.divf %189, %190 : vector<4x128xf32>
    %192 = arith.mulf %191, %29 : vector<4x128xf32>
    %193 = arith.subf %192, %32 : vector<4x128xf32>
    %194 = vector.extract_strided_slice %193 {offsets = [0, 0], sizes = [4, 32], strides = [1, 1]} : vector<4x128xf32> to vector<4x32xf32>
    %195 = vector.extract_strided_slice %193 {offsets = [0, 32], sizes = [4, 32], strides = [1, 1]} : vector<4x128xf32> to vector<4x32xf32>
    %196 = vector.extract_strided_slice %193 {offsets = [0, 64], sizes = [4, 32], strides = [1, 1]} : vector<4x128xf32> to vector<4x32xf32>
    %197 = vector.extract_strided_slice %193 {offsets = [0, 96], sizes = [4, 32], strides = [1, 1]} : vector<4x128xf32> to vector<4x32xf32>
    %198 = arith.mulf %195, %153 : vector<4x32xf32>
    %199 = arith.mulf %194, %196 : vector<4x32xf32>
    %200 = arith.addf %198, %199 : vector<4x32xf32>
    %201 = math.tanh %200 : vector<4x32xf32>
    %202 = arith.mulf %197, %201 : vector<4x32xf32>
    %cst_61 = arith.constant dense<0.000000e+00> : vector<4x128xf32>
    %203 = tpu.matmul %202, %12, %cst_61 {dimension_numbers = #tpu.dot_dimension_numbers<[1], [0], [0], [1], [0, 0, 1, 1], [], []>} : vector<4x32xf32>, vector<32x128xf32>, vector<4x128xf32> -> vector<4x128xf32>
    %204 = arith.addf %203, %182 : vector<4x128xf32>
    %205 = arith.addf %204, %17 : vector<4x128xf32>
    %206 = arith.mulf %205, %29 : vector<4x128xf32>
    %207 = arith.negf %206 : vector<4x128xf32>
    %208 = math.exp %207 : vector<4x128xf32>
    %cst_62 = arith.constant 1.000000e+00 : f32
    %209 = vector.broadcast %cst_62 : f32 to vector<4x128xf32>
    %210 = arith.addf %209, %208 : vector<4x128xf32>
    %211 = arith.divf %209, %210 : vector<4x128xf32>
    %212 = arith.mulf %211, %29 : vector<4x128xf32>
    %213 = arith.subf %212, %32 : vector<4x128xf32>
    %214 = vector.extract_strided_slice %213 {offsets = [0, 0], sizes = [4, 32], strides = [1, 1]} : vector<4x128xf32> to vector<4x32xf32>
    %215 = vector.extract_strided_slice %213 {offsets = [0, 32], sizes = [4, 32], strides = [1, 1]} : vector<4x128xf32> to vector<4x32xf32>
    %216 = vector.extract_strided_slice %213 {offsets = [0, 64], sizes = [4, 32], strides = [1, 1]} : vector<4x128xf32> to vector<4x32xf32>
    %217 = vector.extract_strided_slice %213 {offsets = [0, 96], sizes = [4, 32], strides = [1, 1]} : vector<4x128xf32> to vector<4x32xf32>
    %218 = arith.mulf %215, %173 : vector<4x32xf32>
    %219 = arith.mulf %214, %216 : vector<4x32xf32>
    %220 = arith.addf %218, %219 : vector<4x32xf32>
    %221 = math.tanh %220 : vector<4x32xf32>
    %222 = arith.mulf %217, %221 : vector<4x32xf32>
    %cst_63 = arith.constant dense<0.000000e+00> : vector<4x128xf32>
    %223 = tpu.matmul %222, %14, %cst_63 {dimension_numbers = #tpu.dot_dimension_numbers<[1], [0], [0], [1], [0, 0, 1, 1], [], []>} : vector<4x32xf32>, vector<32x128xf32>, vector<4x128xf32> -> vector<4x128xf32>
    %224 = arith.addf %223, %20 : vector<4x128xf32>
    %225 = vector.extract_strided_slice %224 {offsets = [0, 0], sizes = [4, 50], strides = [1, 1]} : vector<4x128xf32> to vector<4x50xf32>
    %c3 = arith.constant 3 : index
    %c0_64 = arith.constant 0 : index
    %c0_65 = arith.constant 0 : index
    %226 = vector.load %arg11[%c3, %c0_64, %c0_65] : memref<8x4x50xf32, #tpu.memory_space<vmem>>, vector<1x4x50xf32>
    %227 = vector.shape_cast %226 : vector<1x4x50xf32> to vector<4x50xf32>
    %228 = vector.shape_cast %225 : vector<4x50xf32> to vector<1x4x50xf32>
    tpu.vector_store %arg11[%c3, %c0_64, %c0_65], %228 {strides = array<i32>} : memref<8x4x50xf32, #tpu.memory_space<vmem>>, vector<1x4x50xf32>,
    %cst_66 = arith.constant dense<0.000000e+00> : vector<4x128xf32>
    %229 = tpu.matmul %222, %13, %cst_66 {dimension_numbers = #tpu.dot_dimension_numbers<[1], [0], [0], [1], [0, 0, 1, 1], [], []>} : vector<4x32xf32>, vector<32x128xf32>, vector<4x128xf32> -> vector<4x128xf32>
    %230 = vector.extract_strided_slice %10 {offsets = [16, 0], sizes = [4, 128], strides = [1, 1]} : vector<32x128xf32> to vector<4x128xf32>
    %cst_67 = arith.constant dense<0.000000e+00> : vector<4x128xf32>
    %231 = tpu.matmul %202, %11, %cst_67 {dimension_numbers = #tpu.dot_dimension_numbers<[1], [0], [0], [1], [0, 0, 1, 1], [], []>} : vector<4x32xf32>, vector<32x128xf32>, vector<4x128xf32> -> vector<4x128xf32>
    %232 = arith.addf %230, %231 : vector<4x128xf32>
    %233 = arith.mulf %232, %29 : vector<4x128xf32>
    %234 = arith.negf %233 : vector<4x128xf32>
    %235 = math.exp %234 : vector<4x128xf32>
    %cst_68 = arith.constant 1.000000e+00 : f32
    %236 = vector.broadcast %cst_68 : f32 to vector<4x128xf32>
    %237 = arith.addf %236, %235 : vector<4x128xf32>
    %238 = arith.divf %236, %237 : vector<4x128xf32>
    %239 = arith.mulf %238, %29 : vector<4x128xf32>
    %240 = arith.subf %239, %32 : vector<4x128xf32>
    %241 = vector.extract_strided_slice %240 {offsets = [0, 0], sizes = [4, 32], strides = [1, 1]} : vector<4x128xf32> to vector<4x32xf32>
    %242 = vector.extract_strided_slice %240 {offsets = [0, 32], sizes = [4, 32], strides = [1, 1]} : vector<4x128xf32> to vector<4x32xf32>
    %243 = vector.extract_strided_slice %240 {offsets = [0, 64], sizes = [4, 32], strides = [1, 1]} : vector<4x128xf32> to vector<4x32xf32>
    %244 = vector.extract_strided_slice %240 {offsets = [0, 96], sizes = [4, 32], strides = [1, 1]} : vector<4x128xf32> to vector<4x32xf32>
    %245 = arith.mulf %242, %200 : vector<4x32xf32>
    %246 = arith.mulf %241, %243 : vector<4x32xf32>
    %247 = arith.addf %245, %246 : vector<4x32xf32>
    %248 = math.tanh %247 : vector<4x32xf32>
    %249 = arith.mulf %244, %248 : vector<4x32xf32>
    %cst_69 = arith.constant dense<0.000000e+00> : vector<4x128xf32>
    %250 = tpu.matmul %249, %12, %cst_69 {dimension_numbers = #tpu.dot_dimension_numbers<[1], [0], [0], [1], [0, 0, 1, 1], [], []>} : vector<4x32xf32>, vector<32x128xf32>, vector<4x128xf32> -> vector<4x128xf32>
    %251 = arith.addf %250, %229 : vector<4x128xf32>
    %252 = arith.addf %251, %17 : vector<4x128xf32>
    %253 = arith.mulf %252, %29 : vector<4x128xf32>
    %254 = arith.negf %253 : vector<4x128xf32>
    %255 = math.exp %254 : vector<4x128xf32>
    %cst_70 = arith.constant 1.000000e+00 : f32
    %256 = vector.broadcast %cst_70 : f32 to vector<4x128xf32>
    %257 = arith.addf %256, %255 : vector<4x128xf32>
    %258 = arith.divf %256, %257 : vector<4x128xf32>
    %259 = arith.mulf %258, %29 : vector<4x128xf32>
    %260 = arith.subf %259, %32 : vector<4x128xf32>
    %261 = vector.extract_strided_slice %260 {offsets = [0, 0], sizes = [4, 32], strides = [1, 1]} : vector<4x128xf32> to vector<4x32xf32>
    %262 = vector.extract_strided_slice %260 {offsets = [0, 32], sizes = [4, 32], strides = [1, 1]} : vector<4x128xf32> to vector<4x32xf32>
    %263 = vector.extract_strided_slice %260 {offsets = [0, 64], sizes = [4, 32], strides = [1, 1]} : vector<4x128xf32> to vector<4x32xf32>
    %264 = vector.extract_strided_slice %260 {offsets = [0, 96], sizes = [4, 32], strides = [1, 1]} : vector<4x128xf32> to vector<4x32xf32>
    %265 = arith.mulf %262, %220 : vector<4x32xf32>
    %266 = arith.mulf %261, %263 : vector<4x32xf32>
    %267 = arith.addf %265, %266 : vector<4x32xf32>
    %268 = math.tanh %267 : vector<4x32xf32>
    %269 = arith.mulf %264, %268 : vector<4x32xf32>
    %cst_71 = arith.constant dense<0.000000e+00> : vector<4x128xf32>
    %270 = tpu.matmul %269, %14, %cst_71 {dimension_numbers = #tpu.dot_dimension_numbers<[1], [0], [0], [1], [0, 0, 1, 1], [], []>} : vector<4x32xf32>, vector<32x128xf32>, vector<4x128xf32> -> vector<4x128xf32>
    %271 = arith.addf %270, %20 : vector<4x128xf32>
    %272 = vector.extract_strided_slice %271 {offsets = [0, 0], sizes = [4, 50], strides = [1, 1]} : vector<4x128xf32> to vector<4x50xf32>
    %c4 = arith.constant 4 : index
    %c0_72 = arith.constant 0 : index
    %c0_73 = arith.constant 0 : index
    %273 = vector.load %arg11[%c4, %c0_72, %c0_73] : memref<8x4x50xf32, #tpu.memory_space<vmem>>, vector<1x4x50xf32>
    %274 = vector.shape_cast %273 : vector<1x4x50xf32> to vector<4x50xf32>
    %275 = vector.shape_cast %272 : vector<4x50xf32> to vector<1x4x50xf32>
    tpu.vector_store %arg11[%c4, %c0_72, %c0_73], %275 {strides = array<i32>} : memref<8x4x50xf32, #tpu.memory_space<vmem>>, vector<1x4x50xf32>,
    %cst_74 = arith.constant dense<0.000000e+00> : vector<4x128xf32>
    %276 = tpu.matmul %269, %13, %cst_74 {dimension_numbers = #tpu.dot_dimension_numbers<[1], [0], [0], [1], [0, 0, 1, 1], [], []>} : vector<4x32xf32>, vector<32x128xf32>, vector<4x128xf32> -> vector<4x128xf32>
    %277 = vector.extract_strided_slice %10 {offsets = [20, 0], sizes = [4, 128], strides = [1, 1]} : vector<32x128xf32> to vector<4x128xf32>
    %cst_75 = arith.constant dense<0.000000e+00> : vector<4x128xf32>
    %278 = tpu.matmul %249, %11, %cst_75 {dimension_numbers = #tpu.dot_dimension_numbers<[1], [0], [0], [1], [0, 0, 1, 1], [], []>} : vector<4x32xf32>, vector<32x128xf32>, vector<4x128xf32> -> vector<4x128xf32>
    %279 = arith.addf %277, %278 : vector<4x128xf32>
    %280 = arith.mulf %279, %29 : vector<4x128xf32>
    %281 = arith.negf %280 : vector<4x128xf32>
    %282 = math.exp %281 : vector<4x128xf32>
    %cst_76 = arith.constant 1.000000e+00 : f32
    %283 = vector.broadcast %cst_76 : f32 to vector<4x128xf32>
    %284 = arith.addf %283, %282 : vector<4x128xf32>
    %285 = arith.divf %283, %284 : vector<4x128xf32>
    %286 = arith.mulf %285, %29 : vector<4x128xf32>
    %287 = arith.subf %286, %32 : vector<4x128xf32>
    %288 = vector.extract_strided_slice %287 {offsets = [0, 0], sizes = [4, 32], strides = [1, 1]} : vector<4x128xf32> to vector<4x32xf32>
    %289 = vector.extract_strided_slice %287 {offsets = [0, 32], sizes = [4, 32], strides = [1, 1]} : vector<4x128xf32> to vector<4x32xf32>
    %290 = vector.extract_strided_slice %287 {offsets = [0, 64], sizes = [4, 32], strides = [1, 1]} : vector<4x128xf32> to vector<4x32xf32>
    %291 = vector.extract_strided_slice %287 {offsets = [0, 96], sizes = [4, 32], strides = [1, 1]} : vector<4x128xf32> to vector<4x32xf32>
    %292 = arith.mulf %289, %247 : vector<4x32xf32>
    %293 = arith.mulf %288, %290 : vector<4x32xf32>
    %294 = arith.addf %292, %293 : vector<4x32xf32>
    %295 = math.tanh %294 : vector<4x32xf32>
    %296 = arith.mulf %291, %295 : vector<4x32xf32>
    %cst_77 = arith.constant dense<0.000000e+00> : vector<4x128xf32>
    %297 = tpu.matmul %296, %12, %cst_77 {dimension_numbers = #tpu.dot_dimension_numbers<[1], [0], [0], [1], [0, 0, 1, 1], [], []>} : vector<4x32xf32>, vector<32x128xf32>, vector<4x128xf32> -> vector<4x128xf32>
    %298 = arith.addf %297, %276 : vector<4x128xf32>
    %299 = arith.addf %298, %17 : vector<4x128xf32>
    %300 = arith.mulf %299, %29 : vector<4x128xf32>
    %301 = arith.negf %300 : vector<4x128xf32>
    %302 = math.exp %301 : vector<4x128xf32>
    %cst_78 = arith.constant 1.000000e+00 : f32
    %303 = vector.broadcast %cst_78 : f32 to vector<4x128xf32>
    %304 = arith.addf %303, %302 : vector<4x128xf32>
    %305 = arith.divf %303, %304 : vector<4x128xf32>
    %306 = arith.mulf %305, %29 : vector<4x128xf32>
    %307 = arith.subf %306, %32 : vector<4x128xf32>
    %308 = vector.extract_strided_slice %307 {offsets = [0, 0], sizes = [4, 32], strides = [1, 1]} : vector<4x128xf32> to vector<4x32xf32>
    %309 = vector.extract_strided_slice %307 {offsets = [0, 32], sizes = [4, 32], strides = [1, 1]} : vector<4x128xf32> to vector<4x32xf32>
    %310 = vector.extract_strided_slice %307 {offsets = [0, 64], sizes = [4, 32], strides = [1, 1]} : vector<4x128xf32> to vector<4x32xf32>
    %311 = vector.extract_strided_slice %307 {offsets = [0, 96], sizes = [4, 32], strides = [1, 1]} : vector<4x128xf32> to vector<4x32xf32>
    %312 = arith.mulf %309, %267 : vector<4x32xf32>
    %313 = arith.mulf %308, %310 : vector<4x32xf32>
    %314 = arith.addf %312, %313 : vector<4x32xf32>
    %315 = math.tanh %314 : vector<4x32xf32>
    %316 = arith.mulf %311, %315 : vector<4x32xf32>
    %cst_79 = arith.constant dense<0.000000e+00> : vector<4x128xf32>
    %317 = tpu.matmul %316, %14, %cst_79 {dimension_numbers = #tpu.dot_dimension_numbers<[1], [0], [0], [1], [0, 0, 1, 1], [], []>} : vector<4x32xf32>, vector<32x128xf32>, vector<4x128xf32> -> vector<4x128xf32>
    %318 = arith.addf %317, %20 : vector<4x128xf32>
    %319 = vector.extract_strided_slice %318 {offsets = [0, 0], sizes = [4, 50], strides = [1, 1]} : vector<4x128xf32> to vector<4x50xf32>
    %c5 = arith.constant 5 : index
    %c0_80 = arith.constant 0 : index
    %c0_81 = arith.constant 0 : index
    %320 = vector.load %arg11[%c5, %c0_80, %c0_81] : memref<8x4x50xf32, #tpu.memory_space<vmem>>, vector<1x4x50xf32>
    %321 = vector.shape_cast %320 : vector<1x4x50xf32> to vector<4x50xf32>
    %322 = vector.shape_cast %319 : vector<4x50xf32> to vector<1x4x50xf32>
    tpu.vector_store %arg11[%c5, %c0_80, %c0_81], %322 {strides = array<i32>} : memref<8x4x50xf32, #tpu.memory_space<vmem>>, vector<1x4x50xf32>,
    %cst_82 = arith.constant dense<0.000000e+00> : vector<4x128xf32>
    %323 = tpu.matmul %316, %13, %cst_82 {dimension_numbers = #tpu.dot_dimension_numbers<[1], [0], [0], [1], [0, 0, 1, 1], [], []>} : vector<4x32xf32>, vector<32x128xf32>, vector<4x128xf32> -> vector<4x128xf32>
    %324 = vector.extract_strided_slice %10 {offsets = [24, 0], sizes = [4, 128], strides = [1, 1]} : vector<32x128xf32> to vector<4x128xf32>
    %cst_83 = arith.constant dense<0.000000e+00> : vector<4x128xf32>
    %325 = tpu.matmul %296, %11, %cst_83 {dimension_numbers = #tpu.dot_dimension_numbers<[1], [0], [0], [1], [0, 0, 1, 1], [], []>} : vector<4x32xf32>, vector<32x128xf32>, vector<4x128xf32> -> vector<4x128xf32>
    %326 = arith.addf %324, %325 : vector<4x128xf32>
    %327 = arith.mulf %326, %29 : vector<4x128xf32>
    %328 = arith.negf %327 : vector<4x128xf32>
    %329 = math.exp %328 : vector<4x128xf32>
    %cst_84 = arith.constant 1.000000e+00 : f32
    %330 = vector.broadcast %cst_84 : f32 to vector<4x128xf32>
    %331 = arith.addf %330, %329 : vector<4x128xf32>
    %332 = arith.divf %330, %331 : vector<4x128xf32>
    %333 = arith.mulf %332, %29 : vector<4x128xf32>
    %334 = arith.subf %333, %32 : vector<4x128xf32>
    %335 = vector.extract_strided_slice %334 {offsets = [0, 0], sizes = [4, 32], strides = [1, 1]} : vector<4x128xf32> to vector<4x32xf32>
    %336 = vector.extract_strided_slice %334 {offsets = [0, 32], sizes = [4, 32], strides = [1, 1]} : vector<4x128xf32> to vector<4x32xf32>
    %337 = vector.extract_strided_slice %334 {offsets = [0, 64], sizes = [4, 32], strides = [1, 1]} : vector<4x128xf32> to vector<4x32xf32>
    %338 = vector.extract_strided_slice %334 {offsets = [0, 96], sizes = [4, 32], strides = [1, 1]} : vector<4x128xf32> to vector<4x32xf32>
    %339 = arith.mulf %336, %294 : vector<4x32xf32>
    %340 = arith.mulf %335, %337 : vector<4x32xf32>
    %341 = arith.addf %339, %340 : vector<4x32xf32>
    %342 = math.tanh %341 : vector<4x32xf32>
    %343 = arith.mulf %338, %342 : vector<4x32xf32>
    %cst_85 = arith.constant dense<0.000000e+00> : vector<4x128xf32>
    %344 = tpu.matmul %343, %12, %cst_85 {dimension_numbers = #tpu.dot_dimension_numbers<[1], [0], [0], [1], [0, 0, 1, 1], [], []>} : vector<4x32xf32>, vector<32x128xf32>, vector<4x128xf32> -> vector<4x128xf32>
    %345 = arith.addf %344, %323 : vector<4x128xf32>
    %346 = arith.addf %345, %17 : vector<4x128xf32>
    %347 = arith.mulf %346, %29 : vector<4x128xf32>
    %348 = arith.negf %347 : vector<4x128xf32>
    %349 = math.exp %348 : vector<4x128xf32>
    %cst_86 = arith.constant 1.000000e+00 : f32
    %350 = vector.broadcast %cst_86 : f32 to vector<4x128xf32>
    %351 = arith.addf %350, %349 : vector<4x128xf32>
    %352 = arith.divf %350, %351 : vector<4x128xf32>
    %353 = arith.mulf %352, %29 : vector<4x128xf32>
    %354 = arith.subf %353, %32 : vector<4x128xf32>
    %355 = vector.extract_strided_slice %354 {offsets = [0, 0], sizes = [4, 32], strides = [1, 1]} : vector<4x128xf32> to vector<4x32xf32>
    %356 = vector.extract_strided_slice %354 {offsets = [0, 32], sizes = [4, 32], strides = [1, 1]} : vector<4x128xf32> to vector<4x32xf32>
    %357 = vector.extract_strided_slice %354 {offsets = [0, 64], sizes = [4, 32], strides = [1, 1]} : vector<4x128xf32> to vector<4x32xf32>
    %358 = vector.extract_strided_slice %354 {offsets = [0, 96], sizes = [4, 32], strides = [1, 1]} : vector<4x128xf32> to vector<4x32xf32>
    %359 = arith.mulf %356, %314 : vector<4x32xf32>
    %360 = arith.mulf %355, %357 : vector<4x32xf32>
    %361 = arith.addf %359, %360 : vector<4x32xf32>
    %362 = math.tanh %361 : vector<4x32xf32>
    %363 = arith.mulf %358, %362 : vector<4x32xf32>
    %cst_87 = arith.constant dense<0.000000e+00> : vector<4x128xf32>
    %364 = tpu.matmul %363, %14, %cst_87 {dimension_numbers = #tpu.dot_dimension_numbers<[1], [0], [0], [1], [0, 0, 1, 1], [], []>} : vector<4x32xf32>, vector<32x128xf32>, vector<4x128xf32> -> vector<4x128xf32>
    %365 = arith.addf %364, %20 : vector<4x128xf32>
    %366 = vector.extract_strided_slice %365 {offsets = [0, 0], sizes = [4, 50], strides = [1, 1]} : vector<4x128xf32> to vector<4x50xf32>
    %c6 = arith.constant 6 : index
    %c0_88 = arith.constant 0 : index
    %c0_89 = arith.constant 0 : index
    %367 = vector.load %arg11[%c6, %c0_88, %c0_89] : memref<8x4x50xf32, #tpu.memory_space<vmem>>, vector<1x4x50xf32>
    %368 = vector.shape_cast %367 : vector<1x4x50xf32> to vector<4x50xf32>
    %369 = vector.shape_cast %366 : vector<4x50xf32> to vector<1x4x50xf32>
    tpu.vector_store %arg11[%c6, %c0_88, %c0_89], %369 {strides = array<i32>} : memref<8x4x50xf32, #tpu.memory_space<vmem>>, vector<1x4x50xf32>,
    %cst_90 = arith.constant dense<0.000000e+00> : vector<4x128xf32>
    %370 = tpu.matmul %363, %13, %cst_90 {dimension_numbers = #tpu.dot_dimension_numbers<[1], [0], [0], [1], [0, 0, 1, 1], [], []>} : vector<4x32xf32>, vector<32x128xf32>, vector<4x128xf32> -> vector<4x128xf32>
    %371 = vector.extract_strided_slice %10 {offsets = [28, 0], sizes = [4, 128], strides = [1, 1]} : vector<32x128xf32> to vector<4x128xf32>
    %cst_91 = arith.constant dense<0.000000e+00> : vector<4x128xf32>
    %372 = tpu.matmul %343, %11, %cst_91 {dimension_numbers = #tpu.dot_dimension_numbers<[1], [0], [0], [1], [0, 0, 1, 1], [], []>} : vector<4x32xf32>, vector<32x128xf32>, vector<4x128xf32> -> vector<4x128xf32>
    %373 = arith.addf %371, %372 : vector<4x128xf32>
    %374 = arith.mulf %373, %29 : vector<4x128xf32>
    %375 = arith.negf %374 : vector<4x128xf32>
    %376 = math.exp %375 : vector<4x128xf32>
    %cst_92 = arith.constant 1.000000e+00 : f32
    %377 = vector.broadcast %cst_92 : f32 to vector<4x128xf32>
    %378 = arith.addf %377, %376 : vector<4x128xf32>
    %379 = arith.divf %377, %378 : vector<4x128xf32>
    %380 = arith.mulf %379, %29 : vector<4x128xf32>
    %381 = arith.subf %380, %32 : vector<4x128xf32>
    %382 = vector.extract_strided_slice %381 {offsets = [0, 0], sizes = [4, 32], strides = [1, 1]} : vector<4x128xf32> to vector<4x32xf32>
    %383 = vector.extract_strided_slice %381 {offsets = [0, 32], sizes = [4, 32], strides = [1, 1]} : vector<4x128xf32> to vector<4x32xf32>
    %384 = vector.extract_strided_slice %381 {offsets = [0, 64], sizes = [4, 32], strides = [1, 1]} : vector<4x128xf32> to vector<4x32xf32>
    %385 = vector.extract_strided_slice %381 {offsets = [0, 96], sizes = [4, 32], strides = [1, 1]} : vector<4x128xf32> to vector<4x32xf32>
    %386 = arith.mulf %383, %341 : vector<4x32xf32>
    %387 = arith.mulf %382, %384 : vector<4x32xf32>
    %388 = arith.addf %386, %387 : vector<4x32xf32>
    %389 = math.tanh %388 : vector<4x32xf32>
    %390 = arith.mulf %385, %389 : vector<4x32xf32>
    %cst_93 = arith.constant dense<0.000000e+00> : vector<4x128xf32>
    %391 = tpu.matmul %390, %12, %cst_93 {dimension_numbers = #tpu.dot_dimension_numbers<[1], [0], [0], [1], [0, 0, 1, 1], [], []>} : vector<4x32xf32>, vector<32x128xf32>, vector<4x128xf32> -> vector<4x128xf32>
    %392 = arith.addf %391, %370 : vector<4x128xf32>
    %393 = arith.addf %392, %17 : vector<4x128xf32>
    %394 = arith.mulf %393, %29 : vector<4x128xf32>
    %395 = arith.negf %394 : vector<4x128xf32>
    %396 = math.exp %395 : vector<4x128xf32>
    %cst_94 = arith.constant 1.000000e+00 : f32
    %397 = vector.broadcast %cst_94 : f32 to vector<4x128xf32>
    %398 = arith.addf %397, %396 : vector<4x128xf32>
    %399 = arith.divf %397, %398 : vector<4x128xf32>
    %400 = arith.mulf %399, %29 : vector<4x128xf32>
    %401 = arith.subf %400, %32 : vector<4x128xf32>
    %402 = vector.extract_strided_slice %401 {offsets = [0, 0], sizes = [4, 32], strides = [1, 1]} : vector<4x128xf32> to vector<4x32xf32>
    %403 = vector.extract_strided_slice %401 {offsets = [0, 32], sizes = [4, 32], strides = [1, 1]} : vector<4x128xf32> to vector<4x32xf32>
    %404 = vector.extract_strided_slice %401 {offsets = [0, 64], sizes = [4, 32], strides = [1, 1]} : vector<4x128xf32> to vector<4x32xf32>
    %405 = vector.extract_strided_slice %401 {offsets = [0, 96], sizes = [4, 32], strides = [1, 1]} : vector<4x128xf32> to vector<4x32xf32>
    %406 = arith.mulf %403, %361 : vector<4x32xf32>
    %407 = arith.mulf %402, %404 : vector<4x32xf32>
    %408 = arith.addf %406, %407 : vector<4x32xf32>
    %409 = math.tanh %408 : vector<4x32xf32>
    %410 = arith.mulf %405, %409 : vector<4x32xf32>
    %cst_95 = arith.constant dense<0.000000e+00> : vector<4x128xf32>
    %411 = tpu.matmul %410, %14, %cst_95 {dimension_numbers = #tpu.dot_dimension_numbers<[1], [0], [0], [1], [0, 0, 1, 1], [], []>} : vector<4x32xf32>, vector<32x128xf32>, vector<4x128xf32> -> vector<4x128xf32>
    %412 = arith.addf %411, %20 : vector<4x128xf32>
    %413 = vector.extract_strided_slice %412 {offsets = [0, 0], sizes = [4, 50], strides = [1, 1]} : vector<4x128xf32> to vector<4x50xf32>
    %c7 = arith.constant 7 : index
    %c0_96 = arith.constant 0 : index
    %c0_97 = arith.constant 0 : index
    %414 = vector.load %arg11[%c7, %c0_96, %c0_97] : memref<8x4x50xf32, #tpu.memory_space<vmem>>, vector<1x4x50xf32>
    %415 = vector.shape_cast %414 : vector<1x4x50xf32> to vector<4x50xf32>
    %416 = vector.shape_cast %413 : vector<4x50xf32> to vector<1x4x50xf32>
    tpu.vector_store %arg11[%c7, %c0_96, %c0_97], %416 {strides = array<i32>} : memref<8x4x50xf32, #tpu.memory_space<vmem>>, vector<1x4x50xf32>,
    %c0_98 = arith.constant 0 : index
    %c0_99 = arith.constant 0 : index
    %c0_100 = arith.constant 0 : index
    %417 = vector.load %arg12[%c0_98, %c0_99, %c0_100] : memref<2x4x32xf32, #tpu.memory_space<vmem>>, vector<1x4x32xf32>
    %418 = vector.shape_cast %417 : vector<1x4x32xf32> to vector<4x32xf32>
    %419 = vector.shape_cast %390 : vector<4x32xf32> to vector<1x4x32xf32>
    tpu.vector_store %arg12[%c0_98, %c0_99, %c0_100], %419 {strides = array<i32>} : memref<2x4x32xf32, #tpu.memory_space<vmem>>, vector<1x4x32xf32>,
    %c1_101 = arith.constant 1 : index
    %c0_102 = arith.constant 0 : index
    %c0_103 = arith.constant 0 : index
    %420 = vector.load %arg12[%c1_101, %c0_102, %c0_103] : memref<2x4x32xf32, #tpu.memory_space<vmem>>, vector<1x4x32xf32>
    %421 = vector.shape_cast %420 : vector<1x4x32xf32> to vector<4x32xf32>
    %422 = vector.shape_cast %410 : vector<4x32xf32> to vector<1x4x32xf32>
    tpu.vector_store %arg12[%c1_101, %c0_102, %c0_103], %422 {strides = array<i32>} : memref<2x4x32xf32, #tpu.memory_space<vmem>>, vector<1x4x32xf32>,
    %c0_104 = arith.constant 0 : index
    %c0_105 = arith.constant 0 : index
    %c0_106 = arith.constant 0 : index
    %423 = vector.load %arg13[%c0_104, %c0_105, %c0_106] : memref<2x4x32xf32, #tpu.memory_space<vmem>>, vector<1x4x32xf32>
    %424 = vector.shape_cast %423 : vector<1x4x32xf32> to vector<4x32xf32>
    %425 = vector.shape_cast %388 : vector<4x32xf32> to vector<1x4x32xf32>
    tpu.vector_store %arg13[%c0_104, %c0_105, %c0_106], %425 {strides = array<i32>} : memref<2x4x32xf32, #tpu.memory_space<vmem>>, vector<1x4x32xf32>,
    %c1_107 = arith.constant 1 : index
    %c0_108 = arith.constant 0 : index
    %c0_109 = arith.constant 0 : index
    %426 = vector.load %arg13[%c1_107, %c0_108, %c0_109] : memref<2x4x32xf32, #tpu.memory_space<vmem>>, vector<1x4x32xf32>
    %427 = vector.shape_cast %426 : vector<1x4x32xf32> to vector<4x32xf32>
    %428 = vector.shape_cast %408 : vector<4x32xf32> to vector<1x4x32xf32>
    tpu.vector_store %arg13[%c1_107, %c0_108, %c0_109], %428 {strides = array<i32>} : memref<2x4x32xf32, #tpu.memory_space<vmem>>, vector<1x4x32xf32>,
    return
  }
}

</mosaic_0001>

<bundles_post_ra>
// kernel: rnn_model_forward.1
= control target key start
LH: loop header
LB: loop body
LE: loop exit
PB: predicated region body
PF: predicated region fallthrough
CT: control target
= control target key end

     0   :  { %19 = vsyncpa [#allocation3], 0  ;;  %s2704_s0 = inlined_call_operand.vmem [shape: s32[32,1], index: 0, kind: input, shape index: {}]   ;;  %s2705_s1 = inlined_call_operand.hbm [shape: f32[128,128], index: 1, kind: input, shape index: {}]   ;;  %s2706_s2 = inlined_call_operand.vmem [shape: f32[1,128], index: 2, kind: input, shape index: {}]   ;;  %s2707_s3 = inlined_call_operand.vmem [shape: f32[32,128], index: 3, kind: input, shape index: {}]   ;;  %s2708_s4 = inlined_call_operand.hbm [shape: f32[32,128], index: 4, kind: input, shape index: {}]   ;;  %s2709_s5 = inlined_call_operand.hbm [shape: f32[32,128], index: 5, kind: input, shape index: {}]   ;;  %s2710_s6 = inlined_call_operand.vmem [shape: f32[1,128], index: 6, kind: input, shape index: {}]   ;;  %s2711_s7 = inlined_call_operand.hbm [shape: f32[32,128], index: 7, kind: input, shape index: {}]   ;;  %s2712_s8 = inlined_call_operand.vmem [shape: f32[1,128], index: 8, kind: input, shape index: {}]   ;;  %s2713_s9 = inlined_call_operand.vmem [shape: f32[2,4,32], index: 9, kind: input, shape index: {}]   ;;  %s2714_s10 = inlined_call_operand.vmem [shape: f32[2,4,32], index: 10, kind: input, shape index: {}]   ;;  %s2715_s11 = inlined_call_operand.hbm [shape: f32[8,4,50], index: 11, kind: output, shape index: {0}]   ;;  %s2716_s12 = inlined_call_operand.hbm [shape: f32[2,4,32], index: 12, kind: output, shape index: {1}]   ;;  %s2717_s13 = inlined_call_operand.hbm [shape: f32[2,4,32], index: 13, kind: output, shape index: {2}]  }
   0x1   :  { %20 = vsyncpa [#allocation6], 0 }
   0x2   :  { %21 = vsyncpa [#allocation9], 0 }
   0x3   :  { %22 = vsyncpa [#allocation4], 0 }
   0x4   :  { %23 = vsyncpa [#allocation12], 0  ;;  %s47_s27 = sshll.u32 %s2708_s4, 4  ;;  %s2097_s28 = smov [#allocation5]   ;;  %s48_s27 = int_to_ptr.hbm [resolvable:$true] %s47_s27 }
   0x5   :  { %s49_s29 = sshll.u32 %s2097_s28, 4  ;;  %s30_s15 = sshll.u32 %s2705_s1, 4  ;;  %s50_s29 = int_to_ptr.vmem [resolvable:$true] %s49_s29  ;;  %s31_s15 = int_to_ptr.hbm [resolvable:$true] %s30_s15 }
   0x6   :  { %s2098_s16 = smov 128   ;;  %s2099_s17 = smov 8  }
   0x7   :  { %55 = dma.hbm_to_vmem [thread:$0]  %s48_s27, 512, %s50_s29, [#allocation6], %s2098_s16, %s2098_s16, %s2099_s17  }
   0x8   :  { %s2100_s18 = smov [#allocation2]   ;;  %s60_s22 = sshll.u32 %s2709_s5, 4  ;;  %s61_s22 = int_to_ptr.hbm [resolvable:$true] %s60_s22 }
   0x9   :  { %s32_s19 = sshll.u32 %s2100_s18, 4  ;;  %s75_s24 = sshll.u32 %s2711_s7, 4  ;;  %s33_s19 = int_to_ptr.vmem [resolvable:$true] %s32_s19  ;;  %s76_s24 = int_to_ptr.hbm [resolvable:$true] %s75_s24 }
   0xa   :  { %38 = dma.hbm_to_vmem [thread:$0]  %s31_s15, 2048, %s33_s19, [#allocation3], %s2098_s16, %s2098_s16, %s2099_s17  }
   0xb   :  { %s2101_s25 = smov [#allocation7]   ;;  %s2102_s1 = smov [#allocation8]  }
   0xc   :  { %s62_s26 = sshll.u32 %s2101_s25, 4  ;;  %s77_s27 = sshll.u32 %s2102_s1, 4  ;;  %s63_s26 = int_to_ptr.vmem [resolvable:$true] %s62_s26  ;;  %s78_s27 = int_to_ptr.vmem [resolvable:$true] %s77_s27 }
   0xd   :  { %68 = dma.hbm_to_vmem [thread:$0]  %s61_s22, 512, %s63_s26, [#allocation6], %s2098_s16, %s2098_s16, %s2099_s17  }
   0xe   :  { %83 = dma.hbm_to_vmem [thread:$0]  %s76_s24, 512, %s78_s27, [#allocation9], %s2098_s16, %s2098_s16, %s2099_s17  }
   0xf   :  { %2087 = dma.done.wait [#allocation3], 2048  }
  0x10   :  { %2088 = vsyncadd [#allocation3], 4294965248 }
  0x11   :  { %2089 = dma.done.wait [#allocation6], 1024  }
  0x12   :  { %2090 = vsyncadd [#allocation6], 4294966272 }
  0x13   :  { %2091 = dma.done.wait [#allocation9], 512  }
  0x14   :  { %2092 = vsyncadd [#allocation9], 4294966784  ;;  %v2103_v0 = vmov 0   ;;  %v106_v1 = vld [vmem:[%s2704_s0] sm:$0xff]  ;;  %v151_v2 = vld [vmem:[#allocation2 + $0x78] sm:$0xff]  ;;  %vm220_vm0 = vcmask 261120   ;;  %v110_v24 = vlaneseq }
  0x15   :  { %1798 = vset.pattern.permute.xlu0 %v2103_v0  ;;  %1799 = vset.pattern.permute.xlu2 %v2103_v0  ;;  %v150_v3 = vld [vmem:[#allocation2 + $0x70] sm:$0xff]  ;;  %v149_v4 = vld [vmem:[#allocation2 + $0x68] sm:$0xff]  ;;  %v148_v5 = vld [vmem:[#allocation2 + $0x60] sm:$0xff]  ;;  %s2104_s4 = smov 32   ;;  %v2105_v27 = vmov 1.0   ;;  %v2106_v48 = vmov 0.0  }
  0x16   :  { %1800 = vset.pattern.permute.xlu1 %v2103_v0  ;;  %113 = vperm.xlu0 %1798, %v106_v1   ;;  %v2201_v6 = vld [vmem:[%s2707_s3 + $0x18] sm:$0xff]  ;;  %v2206_v7 = vld [vmem:[%s2707_s3 + $0x10] sm:$0xff]  ;;  %v2212_v9 = vld [vmem:[%s2707_s3 + $0x8] sm:$0xff]  ;;  %v2234_v25 = vand.u32 127, %v110_v24  ;;  %s2107_s25 = smov 64   ;;  %s2109_s5 = smov [#allocation11]  }
  0x17   :  { %156 = vmatpush.msra.mxu0 %v151_v2  ;;  %259 = vmatpush.msra.mxu2 %v2201_v6  ;;  %v147_v8 = vld [vmem:[#allocation2 + $0x58] sm:$0xff]  ;;  %v146_v10 = vld [vmem:[#allocation2 + $0x50] sm:$0xff]  ;;  %v2218_v11 = vld [vmem:[%s2707_s3] sm:$0xff]  ;;  %s1687_s28 = sshll.u32 %s2716_s12, 4  ;;  %s2110_s29 = smov 4   ;;  %s1688_s28 = int_to_ptr.hbm [resolvable:$true] %s1687_s28 }
  0x18   :  { %v214_v12 = vld [vmem:[%s2713_s9] sm:$0xf]  ;;  %v145_v13 = vld [vmem:[#allocation2 + $0x48] sm:$0xff]  ;;  %v143_v15 = vld [vmem:[#allocation2 + $0x38] sm:$0xff]  ;;  %vm209_vm2 = vcmp.ge.s32.totalorder %v2234_v25, 64  ;;  %vm210_vm3 = vcmp.lt.s32.totalorder %v2234_v25, 96 }
  0x19   :  { %157 = vmatpush.msra.mxu0 %v150_v3  ;;  %260 = vmatpush.msra.mxu2 %v2206_v7  ;;  %v144_v14 = vld [vmem:[#allocation2 + $0x40] sm:$0xff]  ;;  %v142_v16 = vld [vmem:[#allocation2 + $0x30] sm:$0xff]  ;;  %v141_v17 = vld [vmem:[#allocation2 + $0x28] sm:$0xff]  ;;  %s1700_s14 = sshll.u32 %s2717_s13, 4  ;;  %s2111_s15 = smov [#allocation13]   ;;  %s1701_s14 = int_to_ptr.hbm [resolvable:$true] %s1700_s14 }
  0x1a   :  { %v140_v18 = vld [vmem:[#allocation2 + $0x20] sm:$0xff]  ;;  %v139_v19 = vld [vmem:[#allocation2 + $0x18] sm:$0xff]  ;;  %v138_v20 = vld [vmem:[#allocation2 + $0x10] sm:$0xff]  ;;  %s1698_s16 = sshll.u32 %s2111_s15, 4  ;;  %s2112_s12 = smov [#allocation10]   ;;  %s1699_s16 = int_to_ptr.vmem [resolvable:$true] %s1698_s16 }
  0x1b   :  { %158 = vmatpush.msra.mxu0 %v149_v4  ;;  %261 = vmatpush.msra.mxu2 %v2212_v9  ;;  %v137_v21 = vld [vmem:[#allocation2 + $0x8] sm:$0xff]  ;;  %v136_v22 = vld [vmem:[#allocation2] sm:$0xff]  ;;  %vm2249_vm4 = vmand %vm209_vm2, %vm210_vm3  ;;  %vm405_vm3 = vcmask 404480   ;;  %s1672_s17 = sshll.u32 %s2112_s12, 4  ;;  %s1674_s19 = sshll.u32 %s2715_s11, 4  ;;  %s1673_s17 = int_to_ptr.vmem [resolvable:$true] %s1672_s17  ;;  %s1675_s19 = int_to_ptr.hbm [resolvable:$true] %s1674_s19 }
  0x1c   :  { %v215_v23 = vld [vmem:[%s2714_s10] sm:$0xf]  ;;  %v2259_v33 = vsel %vm2249_vm4, 2.0, %v2105_v27  ;;  %v2265_v49 = vsel %vm2249_vm4, 1.0, %v2106_v48  ;;  %v2275_v60 = vld [vmem:[#allocation5 + $0x18] sm:$0xff]  ;;  %v2277_v61 = vld [vmem:[#allocation5 + $0x10] sm:$0xff] }
  0x1d   :  { %159 = vmatpush.msra.mxu0 %v148_v5  ;;  %262 = vmatpush.msra.mxu2 %v2218_v11  ;;  %v2247_v28 = vld [vmem:[%s2706_s2] ss:$0 sm:$0xff]  ;;  %v2280_v62 = vld [vmem:[#allocation7 + $0x18] sm:$0xff]  ;;  %v2282_v63 = vld [vmem:[#allocation5 + $0x8] sm:$0xff] }
  0x1e   :  { %1735 = vmatmul.msk.f32.vlgmr.msra.gmra.mxu2 %vm220_vm0, %v214_v12  ;;  %291 = vrot.lane.b32.xlu1 %v215_v23, %s2104_s4  ;;  %v2287_v0 = vld [vmem:[#allocation5] sm:$0xff]  ;;  %v2296_v3 = vld [vmem:[#allocation7 + $0x10] sm:$0xff]  ;;  %v2298_v4 = vld [vmem:[#allocation7 + $0x8] sm:$0xff] }
  0x1f   :  { %160 = vmatpush.msra.mxu0 %v147_v8  ;;  %328 = vmatpush.msra.mxu3 %v2275_v60  ;;  %v2302_v5 = vld [vmem:[#allocation7] sm:$0xff] }
  0x20   :  { %236 = vmatpush.msra.mxu1 %v2280_v62  ;;  %419 = vmatpush.msrb.mxu2 %v2280_v62  ;;  %v1732_v8 = vld [vmem:[%s2713_s9 + $0x4] sm:$0xf]  ;;  %s1685_s9 = sshll.u32 %s2109_s5, 4  ;;  %s1686_s9 = int_to_ptr.vmem [resolvable:$true] %s1685_s9 }
  0x21   :  { %161 = vmatpush.msra.mxu0 %v146_v10  ;;  %329 = vmatpush.msra.mxu3 %v2277_v61  ;;  %v1733_v10 = vld [vmem:[%s2714_s10 + $0x4] sm:$0xf] }
  0x22   :  { %237 = vmatpush.msra.mxu1 %v2296_v3  ;;  %420 = vmatpush.msrb.mxu2 %v2296_v3 }
  0x23   :  { %162 = vmatpush.msra.mxu0 %v145_v13  ;;  %330 = vmatpush.msra.mxu3 %v2282_v63 }
  0x24   :  { %238 = vmatpush.msra.mxu1 %v2298_v4  ;;  %421 = vmatpush.msrb.mxu2 %v2298_v4 }
  0x25   :  { %163 = vmatpush.msra.mxu0 %v144_v14  ;;  %331 = vmatpush.msra.mxu3 %v2287_v0  ;;  %v2325_v14 = vld [vmem:[%s2710_s6] ss:$0 sm:$0xff] }
  0x26   :  { %239 = vmatpush.msra.mxu1 %v2302_v5  ;;  %422 = vmatpush.msrb.mxu2 %v2302_v5 }
  0x27   :  { %164 = vmatpush.msra.mxu0 %v143_v15  ;;  %439 = vmatpush.msrb.mxu3 %v2201_v6 }
  0x28   :  { %1734 = vmatmul.msk.f32.vlgmr.msra.gmra.mxu1 %vm220_vm0, %v1732_v8 }
  0x29   :  { %165 = vmatpush.msra.mxu0 %v142_v16  ;;  %440 = vmatpush.msrb.mxu3 %v2206_v7 }
  0x2b   :  { %166 = vmatpush.msra.mxu0 %v141_v17  ;;  %441 = vmatpush.msrb.mxu3 %v2212_v9 }
  0x2d   :  { %167 = vmatpush.msra.mxu0 %v140_v18  ;;  %442 = vmatpush.msrb.mxu3 %v2218_v11 }
  0x2f   :  { %168 = vmatpush.msra.mxu0 %v139_v19 }
  0x31   :  { %169 = vmatpush.msra.mxu0 %v138_v20 }
  0x33   :  { %170 = vmatpush.msra.mxu0 %v137_v21 }
  0x35   :  { %171 = vmatpush.msra.mxu0 %v136_v22 }
  0x37   :  { %1147 = vmatpush.msrb.mxu0 %v2201_v6 }
  0x39   :  { %1148 = vmatpush.msrb.mxu0 %v2206_v7 }
  0x3b   :  { %1149 = vmatpush.msrb.mxu0 %v2212_v9 }
  0x3d   :  { %1150 = vmatpush.msrb.mxu0 %v2218_v11 }
  0x88   :  { %v114_v26 = vpop.permute.xlu0 %113 }
  0x89   :  { %vm124_vm1 = vcmp.eq.s32.totalorder %v114_v26, %v2234_v25 }
  0x8a   :  { %1728 = vmatmul.msk.f32.vlgmr.msra.gmra.mxu0 %vm124_vm1, %v2105_v27 }
  0x8b   :  { %1326 = vmatpush.msra.mxu0 %v2201_v6 }
  0x8d   :  { %1327 = vmatpush.msra.mxu0 %v2206_v7 }
  0x8f   :  { %1328 = vmatpush.msra.mxu0 %v2212_v9 }
  0x90   :  { %v292_v55 = vpop.permute.xlu1 %291 }
  0x91   :  { %1329 = vmatpush.msra.mxu0 %v2218_v11 }
  0xa1   :  { %v264_v31 = vpop.f32.mrf.mxu2 }
  0xa5   :  { %v241_v13 = vpop.f32.mrf.mxu1 }
 0x107   :  { %v173_v30 = vpop.f32.mrf.mxu0 }
 0x108   :  { %v2254_v32 = vadd.f32 %v2247_v28, %v173_v30 }
 0x10a   :  { %v267_v34 = vadd.f32 %v264_v31, %v2254_v32 }
 0x10c   :  { %v268_v35 = vmul.f32 %v267_v34, %v2259_v33 }
 0x10e   :  { %v1736_v36 = vmul.f32 -1.442695, %v268_v35 }
 0x110   :  { %1804 = vpow2.f32 %v1736_v36 }
 0x116   :  { %v1805_v37 = vpop.eup %1804 }
 0x117   :  { %v272_v38 = vadd.f32 1.0, %v1805_v37 }
 0x119   :  { %1806 = vrcp.f32 %v272_v38  ;;  %v284_v42 = vand.u32 2147483648, %v272_v38  ;;  %v282_v44 = vand.u32 2147483647, %v272_v38  ;;  %vm278_vm6 = vweird.f32 %v272_v38 }
 0x11b   :  { %v285_v46 = vor.u32 1.1754944e-38, %v284_v42  ;;  %vm283_vm8 = vcmp.eq.f32.partialorder %v282_v44, 8.507059e+37 }
 0x11f   :  { %v1807_v39 = vpop.eup %1806 }
 0x120   :  { %v274_v40 = vmul.f32 %v1807_v39, %v272_v38  ;;  %vm279_vm5 = vweird.f32 %v1807_v39 }
 0x121   :  { %vm280_vm7 = vmor %vm278_vm6, %vm279_vm5 }
 0x122   :  { %v275_v41 = vsub.f32 1.0, %v274_v40 }
 0x124   :  { %v276_v43 = vmul.f32 %v1807_v39, %v275_v41 }
 0x126   :  { %v277_v45 = vadd.f32 %v1807_v39, %v276_v43 }
 0x128   :  { %v281_v47 = vsel %vm280_vm7, %v1807_v39, %v277_v45 }
 0x129   :  { %v286_v50 = vsel %vm283_vm8, %v285_v46, %v281_v47 }
 0x12a   :  { %v288_v51 = vmul.f32 %v286_v50, %v2259_v33 }
 0x12c   :  { %v289_v52 = vsub.f32 %v288_v51, %v2265_v49 }
 0x12e   :  { %296 = vrot.lane.b32.xlu0 %v289_v52, %s2107_s25  ;;  %v294_v56 = vmul.f32 %v292_v55, %v289_v52 }
 0x1a0   :  { %v297_v53 = vpop.permute.xlu0 %296 }
 0x1a1   :  { %v299_v54 = vmul.f32 %v297_v53, %v289_v52 }
 0x1a3   :  { %301 = vrot.lane.b32.xlu1 %v299_v54, %s2104_s4 }
 0x215   :  { %v302_v57 = vpop.permute.xlu1 %301 }
 0x216   :  { %v2271_v58 = vadd.f32 %v302_v57, %v294_v56 }
 0x218   :  { %1808 = vtanh.f32 %v2271_v58 }
 0x21e   :  { %v1809_v59 = vpop.eup %1808 }
 0x21f   :  { %307 = vrot.lane.b32.xlu2 %v1809_v59, %s2107_s25 }
 0x279   :  { %v308_v1 = vpop.permute.xlu2 %307 }
 0x27a   :  { %v310_v2 = vmul.f32 %v308_v1, %v289_v52 }
 0x27c   :  { %312 = vrot.lane.b32.xlu2 %v310_v2, %s2104_s4 }
 0x284   :  { %360 = vrot.lane.b32.xlu2 %v1733_v10, %s2104_s4 }
 0x2d6   :  { %v313_v12 = vpop.permute.xlu2 %312 }
 0x2d7   :  { %1737 = vmatmul.msk.f32.vlgmr.msra.gmra.mxu3 %vm220_vm0, %v313_v12 }
 0x2d8   :  { %598 = vmatpush.msra.mxu3 %v2280_v62 }
 0x2da   :  { %599 = vmatpush.msra.mxu3 %v2296_v3 }
 0x2dc   :  { %600 = vmatpush.msra.mxu3 %v2298_v4 }
 0x2de   :  { %601 = vmatpush.msra.mxu3 %v2302_v5  ;;  %v361_v10 = vpop.permute.xlu2 %360 }
 0x2df   :  { %1741 = vmatmul.msk.f32.vlgmr.msrb.gmra.mxu3 %vm220_vm0, %v313_v12 }
 0x35a   :  { %v333_v15 = vpop.f32.mrf.mxu3 }
 0x35b   :  { %v334_v16 = vadd.f32 %v333_v15, %v241_v13 }
 0x35d   :  { %v336_v17 = vadd.f32 %v2325_v14, %v334_v16  ;;  %v474_v16 = vrot.slane %v2271_v58, 4  ;;  %v2352_v58 = vld [vmem:[#allocation8 + $0x18] sm:$0xff] }
 0x35e   :  { %397 = vmatpush.msrb.mxu1 %v2352_v58  ;;  %576 = vmatpush.msra.mxu2 %v2352_v58 }
 0x35f   :  { %v337_v18 = vmul.f32 %v336_v17, %v2259_v33  ;;  %751 = vmatpush.msrb.mxu3 %v2352_v58 }
 0x361   :  { %v1738_v19 = vmul.f32 -1.442695, %v337_v18 }
 0x362   :  { %v444_v20 = vpop.f32.mrf.mxu3 }
 0x363   :  { %1810 = vpow2.f32 %v1738_v19  ;;  %v448_v21 = vrot.slane %v444_v20, 4 }
 0x365   :  { %v450_v22 = vadd.f32 %v448_v21, %v2254_v32 }
 0x367   :  { %v451_v23 = vmul.f32 %v450_v22, %v2259_v33  ;;  %v107_v22 = vld [vmem:[%s2704_s0 + $0x8] sm:$0xff] }
 0x369   :  { %v1811_v24 = vpop.eup %1810  ;;  %v1742_v26 = vmul.f32 -1.442695, %v451_v23 }
 0x36a   :  { %v341_v29 = vadd.f32 1.0, %v1811_v24 }
 0x36b   :  { %1812 = vpow2.f32 %v1742_v26  ;;  %v2354_v26 = vld [vmem:[#allocation8 + $0x10] sm:$0xff] }
 0x36c   :  { %1814 = vrcp.f32 %v341_v29  ;;  %v353_v37 = vand.u32 2147483648, %v341_v29  ;;  %v351_v39 = vand.u32 2147483647, %v341_v29  ;;  %vm347_vm10 = vweird.f32 %v341_v29  ;;  %398 = vmatpush.msrb.mxu1 %v2354_v26  ;;  %577 = vmatpush.msra.mxu2 %v2354_v26 }
 0x36d   :  { %752 = vmatpush.msrb.mxu3 %v2354_v26 }
 0x36e   :  { %v354_v41 = vor.u32 1.1754944e-38, %v353_v37  ;;  %vm352_vm12 = vcmp.eq.f32.partialorder %v351_v39, 8.507059e+37  ;;  %v2402_v39 = vld [vmem:[%s2712_s8] ss:$0 sm:$0xff] }
 0x371   :  { %v1813_v30 = vpop.eup %1812 }
 0x372   :  { %v1815_v31 = vpop.eup %1814  ;;  %v455_v34 = vadd.f32 1.0, %v1813_v30  ;;  %v2363_v30 = vld [vmem:[#allocation8] sm:$0xff] }
 0x373   :  { %v343_v35 = vmul.f32 %v1815_v31, %v341_v29  ;;  %vm348_vm9 = vweird.f32 %v1815_v31  ;;  %v2358_v29 = vld [vmem:[#allocation8 + $0x8] sm:$0xff] }
 0x374   :  { %1816 = vrcp.f32 %v455_v34  ;;  %vm349_vm11 = vmor %vm347_vm10, %vm348_vm9  ;;  %v467_v47 = vand.u32 2147483648, %v455_v34  ;;  %v465_v51 = vand.u32 2147483647, %v455_v34  ;;  %vm461_vm14 = vweird.f32 %v455_v34  ;;  %399 = vmatpush.msrb.mxu1 %v2358_v29  ;;  %578 = vmatpush.msra.mxu2 %v2358_v29 }
 0x375   :  { %v344_v36 = vsub.f32 1.0, %v343_v35  ;;  %753 = vmatpush.msrb.mxu3 %v2358_v29 }
 0x376   :  { %v468_v53 = vor.u32 1.1754944e-38, %v467_v47  ;;  %vm466_vm1 = vcmp.eq.f32.partialorder %v465_v51, 8.507059e+37  ;;  %400 = vmatpush.msrb.mxu1 %v2363_v30  ;;  %579 = vmatpush.msra.mxu2 %v2363_v30 }
 0x377   :  { %v345_v38 = vmul.f32 %v1815_v31, %v344_v36  ;;  %754 = vmatpush.msrb.mxu3 %v2363_v30 }
 0x378   :  { %511 = vmatpush.msra.mxu1 %v2275_v60 }
 0x379   :  { %v346_v40 = vadd.f32 %v1815_v31, %v345_v38 }
 0x37a   :  { %v1817_v32 = vpop.eup %1816  ;;  %512 = vmatpush.msra.mxu1 %v2277_v61 }
 0x37b   :  { %v457_v42 = vmul.f32 %v1817_v32, %v455_v34  ;;  %v350_v43 = vsel %vm349_vm11, %v1815_v31, %v346_v40  ;;  %vm462_vm13 = vweird.f32 %v1817_v32 }
 0x37c   :  { %v355_v44 = vsel %vm352_vm12, %v354_v41, %v350_v43  ;;  %vm463_vm15 = vmor %vm461_vm14, %vm462_vm13  ;;  %513 = vmatpush.msra.mxu1 %v2282_v63 }
 0x37d   :  { %v458_v45 = vsub.f32 1.0, %v457_v42  ;;  %v357_v46 = vmul.f32 %v355_v44, %v2259_v33 }
 0x37e   :  { %514 = vmatpush.msra.mxu1 %v2287_v0 }
 0x37f   :  { %v358_v48 = vsub.f32 %v357_v46, %v2265_v49  ;;  %v459_v50 = vmul.f32 %v1817_v32, %v458_v45 }
 0x381   :  { %365 = vrot.lane.b32.xlu0 %v358_v48, %s2107_s25  ;;  %v460_v52 = vadd.f32 %v1817_v32, %v459_v50  ;;  %v363_v12 = vmul.f32 %v361_v10, %v358_v48 }
 0x383   :  { %v464_v54 = vsel %vm463_vm15, %v1817_v32, %v460_v52 }
 0x384   :  { %v469_v55 = vsel %vm466_vm1, %v468_v53, %v464_v54 }
 0x385   :  { %v471_v56 = vmul.f32 %v469_v55, %v2259_v33 }
 0x387   :  { %v472_v57 = vsub.f32 %v471_v56, %v2265_v49 }
 0x389   :  { %478 = vrot.lane.b32.xlu1 %v472_v57, %s2107_s25  ;;  %v476_v17 = vmul.f32 %v474_v16, %v472_v57 }
 0x3f3   :  { %v366_v59 = vpop.permute.xlu0 %365 }
 0x3f4   :  { %v368_v1 = vmul.f32 %v366_v59, %v358_v48 }
 0x3f6   :  { %370 = vrot.lane.b32.xlu0 %v368_v1, %s2104_s4 }
 0x3fb   :  { %v479_v2 = vpop.permute.xlu1 %478 }
 0x3fc   :  { %v481_v8 = vmul.f32 %v479_v2, %v472_v57 }
 0x3fe   :  { %483 = vrot.lane.b32.xlu1 %v481_v8, %s2104_s4 }
 0x468   :  { %v371_v13 = vpop.permute.xlu0 %370 }
 0x469   :  { %v2339_v15 = vadd.f32 %v371_v13, %v363_v12 }
 0x46b   :  { %1818 = vtanh.f32 %v2339_v15 }
 0x470   :  { %v484_v18 = vpop.permute.xlu1 %483 }
 0x471   :  { %v1819_v19 = vpop.eup %1818  ;;  %v2343_v20 = vadd.f32 %v484_v18, %v476_v17 }
 0x472   :  { %376 = vrot.lane.b32.xlu2 %v1819_v19, %s2107_s25 }
 0x473   :  { %1820 = vtanh.f32 %v2343_v20 }
 0x479   :  { %v1821_v21 = vpop.eup %1820 }
 0x47a   :  { %489 = vrot.lane.b32.xlu0 %v1821_v21, %s2107_s25 }
 0x482   :  { %116 = vperm.xlu0 %1798, %v107_v22  }
 0x4cc   :  { %v377_v23 = vpop.permute.xlu2 %376 }
 0x4cd   :  { %v379_v24 = vmul.f32 %v377_v23, %v358_v48 }
 0x4cf   :  { %381 = vrot.lane.b32.xlu1 %v379_v24, %s2104_s4 }
 0x4ec   :  { %v490_v31 = vpop.permute.xlu0 %489 }
 0x4ed   :  { %v492_v34 = vmul.f32 %v490_v31, %v472_v57 }
 0x4ef   :  { %v494_v35 = vrot.slane %v492_v34, 4 }
 0x4f1   :  { %495 = vrot.lane.b32.xlu2 %v494_v35, %s2104_s4 }
 0x4f4   :  { %v117_v36 = vpop.permute.xlu0 %116 }
 0x4f5   :  { %vm125_vm2 = vcmp.eq.s32.totalorder %v117_v36, %v2234_v25 }
 0x4f6   :  { %1729 = vmatmul.msk.f32.gmra.mxu0 %vm125_vm2, %v2105_v27 }
 0x541   :  { %v382_v37 = vpop.permute.xlu1 %381 }
 0x542   :  { %1739 = vmatmul.msk.f32.vlgmr.msrb.gmra.mxu1 %vm220_vm0, %v382_v37  ;;  %1740 = vmatmul.msk.f32.vlgmr.msrb.gmra.mxu2 %vm220_vm0, %v382_v37 }
 0x543   :  { %618 = vmatpush.msrb.mxu1 %v2201_v6  ;;  %686 = vmatpush.msrb.mxu2 %v2275_v60 }
 0x545   :  { %619 = vmatpush.msrb.mxu1 %v2206_v7  ;;  %687 = vmatpush.msrb.mxu2 %v2277_v61 }
 0x547   :  { %620 = vmatpush.msrb.mxu1 %v2212_v9  ;;  %688 = vmatpush.msrb.mxu2 %v2282_v63 }
 0x549   :  { %621 = vmatpush.msrb.mxu1 %v2218_v11  ;;  %689 = vmatpush.msrb.mxu2 %v2287_v0 }
 0x54b   :  { %v496_v38 = vpop.permute.xlu2 %495 }
 0x54c   :  { %1743 = vmatmul.msk.f32.vlgmr.msra.gmra.mxu1 %vm220_vm0, %v496_v38 }
 0x54d   :  { %773 = vmatpush.msra.mxu1 %v2280_v62 }
 0x54f   :  { %774 = vmatpush.msra.mxu1 %v2296_v3 }
 0x551   :  { %775 = vmatpush.msra.mxu1 %v2298_v4 }
 0x553   :  { %776 = vmatpush.msra.mxu1 %v2302_v5 }
 0x554   :  { %1747 = vmatmul.msk.f32.vlgmr.msrb.gmra.mxu1 %vm220_vm0, %v496_v38 }
 0x555   :  { %930 = vmatpush.msrb.mxu1 %v2352_v58 }
 0x557   :  { %931 = vmatpush.msrb.mxu1 %v2354_v26 }
 0x559   :  { %932 = vmatpush.msrb.mxu1 %v2358_v29 }
 0x55b   :  { %933 = vmatpush.msrb.mxu1 %v2363_v30 }
 0x573   :  { %v176_v45 = vpop.f32.mrf.mxu0 }
 0x574   :  { %v2409_v47 = vadd.f32 %v2247_v28, %v176_v45 }
 0x5bf   :  { %v402_v40 = vpop.f32.mrf.mxu1 }
 0x5c0   :  { %v403_v32 = vadd.f32 %v2402_v39, %v402_v40 }
 0x5c2   :  { %406 = vst.msk [vmem:[#allocation10] sm:$0xf] %vm405_vm3, %v403_v32 }
 0x5c5   :  { %v424_v41 = vpop.f32.mrf.mxu2 }
 0x5c9   :  { %v516_v42 = vpop.f32.mrf.mxu1 }
 0x5ca   :  { %v517_v43 = vadd.f32 %v516_v42, %v424_v41 }
 0x5cc   :  { %v519_v44 = vadd.f32 %v2325_v14, %v517_v43 }
 0x5ce   :  { %v520_v46 = vmul.f32 %v519_v44, %v2259_v33 }
 0x5d0   :  { %v1744_v48 = vmul.f32 -1.442695, %v520_v46  ;;  %v650_v46 = vrot.slane %v2343_v20, 4 }
 0x5d1   :  { %v623_v50 = vpop.f32.mrf.mxu1 }
 0x5d2   :  { %1822 = vpow2.f32 %v1744_v48  ;;  %v626_v51 = vadd.f32 %v623_v50, %v2409_v47 }
 0x5d4   :  { %v627_v52 = vmul.f32 %v626_v51, %v2259_v33 }
 0x5d6   :  { %v1748_v53 = vmul.f32 -1.442695, %v627_v52 }
 0x5d8   :  { %v1823_v54 = vpop.eup %1822  ;;  %1824 = vpow2.f32 %v1748_v53 }
 0x5d9   :  { %v524_v55 = vadd.f32 1.0, %v1823_v54 }
 0x5db   :  { %1826 = vrcp.f32 %v524_v55  ;;  %v536_v8 = vand.u32 2147483648, %v524_v55  ;;  %v534_v12 = vand.u32 2147483647, %v524_v55  ;;  %vm530_vm5 = vweird.f32 %v524_v55 }
 0x5dd   :  { %v537_v18 = vor.u32 1.1754944e-38, %v536_v8  ;;  %vm535_vm7 = vcmp.eq.f32.partialorder %v534_v12, 8.507059e+37 }
 0x5de   :  { %v1825_v56 = vpop.eup %1824 }
 0x5df   :  { %v631_v57 = vadd.f32 1.0, %v1825_v56 }
 0x5e1   :  { %v1827_v59 = vpop.eup %1826  ;;  %1828 = vrcp.f32 %v631_v57  ;;  %v643_v23 = vand.u32 2147483648, %v631_v57  ;;  %v641_v34 = vand.u32 2147483647, %v631_v57  ;;  %vm637_vm9 = vweird.f32 %v631_v57 }
 0x5e2   :  { %v526_v1 = vmul.f32 %v1827_v59, %v524_v55  ;;  %vm531_vm4 = vweird.f32 %v1827_v59 }
 0x5e3   :  { %vm532_vm6 = vmor %vm530_vm5, %vm531_vm4  ;;  %v644_v37 = vor.u32 1.1754944e-38, %v643_v23  ;;  %vm642_vm11 = vcmp.eq.f32.partialorder %v641_v34, 8.507059e+37 }
 0x5e4   :  { %v527_v2 = vsub.f32 1.0, %v526_v1 }
 0x5e6   :  { %v528_v10 = vmul.f32 %v1827_v59, %v527_v2 }
 0x5e7   :  { %v1829_v13 = vpop.eup %1828 }
 0x5e8   :  { %v633_v16 = vmul.f32 %v1829_v13, %v631_v57  ;;  %v529_v17 = vadd.f32 %v1827_v59, %v528_v10  ;;  %vm638_vm8 = vweird.f32 %v1829_v13 }
 0x5e9   :  { %vm639_vm10 = vmor %vm637_vm9, %vm638_vm8 }
 0x5ea   :  { %v634_v19 = vsub.f32 1.0, %v633_v16  ;;  %v533_v21 = vsel %vm532_vm6, %v1827_v59, %v529_v17 }
 0x5eb   :  { %v538_v22 = vsel %vm535_vm7, %v537_v18, %v533_v21 }
 0x5ec   :  { %v540_v24 = vmul.f32 %v538_v22, %v2259_v33  ;;  %v635_v31 = vmul.f32 %v1829_v13, %v634_v19 }
 0x5ee   :  { %v541_v35 = vsub.f32 %v540_v24, %v2265_v49  ;;  %v636_v36 = vadd.f32 %v1829_v13, %v635_v31 }
 0x5f0   :  { %544 = vrot.lane.b32.xlu1 %v541_v35, %s2107_s25  ;;  %v640_v38 = vsel %vm639_vm10, %v1829_v13, %v636_v36  ;;  %v542_v53 = vmul.f32 %v541_v35, %v2339_v15 }
 0x5f1   :  { %v645_v40 = vsel %vm642_vm11, %v644_v37, %v640_v38 }
 0x5f2   :  { %v647_v32 = vmul.f32 %v645_v40, %v2259_v33 }
 0x5f4   :  { %v648_v41 = vsub.f32 %v647_v32, %v2265_v49 }
 0x5f6   :  { %654 = vrot.lane.b32.xlu2 %v648_v41, %s2107_s25  ;;  %v652_v48 = vmul.f32 %v650_v46, %v648_v41 }
 0x650   :  { %v655_v42 = vpop.permute.xlu2 %654 }
 0x651   :  { %v657_v43 = vmul.f32 %v655_v42, %v648_v41 }
 0x653   :  { %659 = vrot.lane.b32.xlu1 %v657_v43, %s2104_s4 }
 0x662   :  { %v545_v44 = vpop.permute.xlu1 %544 }
 0x663   :  { %v547_v45 = vmul.f32 %v545_v44, %v541_v35 }
 0x665   :  { %549 = vrot.lane.b32.xlu0 %v547_v45, %s2104_s4 }
 0x6c5   :  { %v660_v50 = vpop.permute.xlu1 %659 }
 0x6c6   :  { %v2422_v51 = vadd.f32 %v660_v50, %v652_v48 }
 0x6c8   :  { %1830 = vtanh.f32 %v2422_v51 }
 0x6ce   :  { %v1831_v52 = vpop.eup %1830 }
 0x6cf   :  { %665 = vrot.lane.b32.xlu0 %v1831_v52, %s2107_s25 }
 0x6d7   :  { %v550_v54 = vpop.permute.xlu0 %549 }
 0x6d8   :  { %v2427_v55 = vadd.f32 %v550_v54, %v542_v53 }
 0x6da   :  { %1832 = vtanh.f32 %v2427_v55 }
 0x6e0   :  { %v1833_v56 = vpop.eup %1832 }
 0x6e1   :  { %555 = vrot.lane.b32.xlu2 %v1833_v56, %s2107_s25 }
 0x73b   :  { %v556_v20 = vpop.permute.xlu2 %555 }
 0x73c   :  { %v558_v57 = vmul.f32 %v556_v20, %v541_v35 }
 0x73e   :  { %560 = vrot.lane.b32.xlu1 %v558_v57, %s2104_s4 }
 0x741   :  { %v666_v59 = vpop.permute.xlu0 %665 }
 0x742   :  { %v668_v1 = vmul.f32 %v666_v59, %v648_v41 }
 0x744   :  { %670 = vrot.lane.b32.xlu2 %v668_v1, %s2104_s4 }
 0x79e   :  { %v671_v15 = vpop.permute.xlu2 %670 }
 0x7b0   :  { %v561_v2 = vpop.permute.xlu1 %560 }
 0x7b1   :  { %1745 = vmatmul.msk.f32.vlgmr.msra.gmra.mxu2 %vm220_vm0, %v561_v2  ;;  %1746 = vmatmul.msk.f32.vlgmr.msra.gmra.mxu3 %vm220_vm0, %v561_v2 }
 0x7b2   :  { %793 = vmatpush.msra.mxu2 %v2201_v6  ;;  %865 = vmatpush.msra.mxu3 %v2275_v60 }
 0x7b4   :  { %794 = vmatpush.msra.mxu2 %v2206_v7  ;;  %866 = vmatpush.msra.mxu3 %v2277_v61 }
 0x7b6   :  { %795 = vmatpush.msra.mxu2 %v2212_v9  ;;  %867 = vmatpush.msra.mxu3 %v2282_v63 }
 0x7b8   :  { %796 = vmatpush.msra.mxu2 %v2218_v11  ;;  %868 = vmatpush.msra.mxu3 %v2287_v0 }
 0x7b9   :  { %1749 = vmatmul.msk.f32.vlgmr.msrb.gmra.mxu2 %vm220_vm0, %v671_v15 }
 0x7ba   :  { %952 = vmatpush.msrb.mxu2 %v2280_v62 }
 0x7bc   :  { %953 = vmatpush.msrb.mxu2 %v2296_v3 }
 0x7be   :  { %954 = vmatpush.msrb.mxu2 %v2298_v4 }
 0x7c0   :  { %955 = vmatpush.msrb.mxu2 %v2302_v5 }
 0x7c1   :  { %1753 = vmatmul.msk.f32.vlgmr.msra.gmra.mxu2 %vm220_vm0, %v671_v15 }
 0x7c2   :  { %1105 = vmatpush.msra.mxu2 %v2352_v58 }
 0x7c4   :  { %1106 = vmatpush.msra.mxu2 %v2354_v26 }
 0x7c6   :  { %1107 = vmatpush.msra.mxu2 %v2358_v29 }
 0x7c8   :  { %1108 = vmatpush.msra.mxu2 %v2363_v30 }
 0x834   :  { %v581_v8 = vpop.f32.mrf.mxu2  ;;  %v603_v12 = vpop.f32.mrf.mxu3 }
 0x835   :  { %v582_v10 = vadd.f32 %v2402_v39, %v581_v8 }
 0x837   :  { %585 = vst.msk [vmem:[#allocation10 + $0x4] sm:$0xf] %vm405_vm3, %v582_v10 }
 0x83c   :  { %v691_v13 = vpop.f32.mrf.mxu2 }
 0x83d   :  { %v692_v16 = vadd.f32 %v691_v13, %v603_v12 }
 0x83f   :  { %v694_v17 = vadd.f32 %v2325_v14, %v692_v16 }
 0x841   :  { %v695_v18 = vmul.f32 %v694_v17, %v2259_v33 }
 0x843   :  { %v1750_v19 = vmul.f32 -1.442695, %v695_v18 }
 0x844   :  { %v798_v21 = vpop.f32.mrf.mxu2 }
 0x845   :  { %1834 = vpow2.f32 %v1750_v19  ;;  %v802_v22 = vrot.slane %v798_v21, 4 }
 0x847   :  { %v804_v23 = vadd.f32 %v802_v22, %v2409_v47 }
 0x849   :  { %v805_v24 = vmul.f32 %v804_v23, %v2259_v33  ;;  %v828_v23 = vrot.slane %v2422_v51, 4 }
 0x84b   :  { %v1835_v31 = vpop.eup %1834  ;;  %v1754_v34 = vmul.f32 -1.442695, %v805_v24 }
 0x84c   :  { %v699_v35 = vadd.f32 1.0, %v1835_v31 }
 0x84d   :  { %1836 = vpow2.f32 %v1754_v34 }
 0x84e   :  { %1838 = vrcp.f32 %v699_v35  ;;  %v711_v41 = vand.u32 2147483648, %v699_v35  ;;  %v709_v43 = vand.u32 2147483647, %v699_v35  ;;  %vm705_vm13 = vweird.f32 %v699_v35 }
 0x850   :  { %v712_v45 = vor.u32 1.1754944e-38, %v711_v41  ;;  %vm710_vm15 = vcmp.eq.f32.partialorder %v709_v43, 8.507059e+37 }
 0x853   :  { %v1837_v36 = vpop.eup %1836 }
 0x854   :  { %v1839_v37 = vpop.eup %1838  ;;  %v809_v38 = vadd.f32 1.0, %v1837_v36 }
 0x855   :  { %v701_v40 = vmul.f32 %v1839_v37, %v699_v35  ;;  %vm706_vm12 = vweird.f32 %v1839_v37 }
 0x856   :  { %1840 = vrcp.f32 %v809_v38  ;;  %vm707_vm14 = vmor %vm705_vm13, %vm706_vm12  ;;  %v821_v54 = vand.u32 2147483648, %v809_v38  ;;  %v819_v57 = vand.u32 2147483647, %v809_v38  ;;  %vm815_vm2 = vweird.f32 %v809_v38 }
 0x857   :  { %v702_v32 = vsub.f32 1.0, %v701_v40 }
 0x858   :  { %v822_v1 = vor.u32 1.1754944e-38, %v821_v54  ;;  %vm820_vm5 = vcmp.eq.f32.partialorder %v819_v57, 8.507059e+37 }
 0x859   :  { %v703_v42 = vmul.f32 %v1839_v37, %v702_v32 }
 0x85b   :  { %v704_v44 = vadd.f32 %v1839_v37, %v703_v42 }
 0x85c   :  { %v1841_v47 = vpop.eup %1840 }
 0x85d   :  { %v811_v46 = vmul.f32 %v1841_v47, %v809_v38  ;;  %v708_v48 = vsel %vm707_vm14, %v1839_v37, %v704_v44  ;;  %vm816_vm1 = vweird.f32 %v1841_v47 }
 0x85e   :  { %v713_v50 = vsel %vm710_vm15, %v712_v45, %v708_v48  ;;  %vm817_vm4 = vmor %vm815_vm2, %vm816_vm1 }
 0x85f   :  { %v812_v52 = vsub.f32 1.0, %v811_v46  ;;  %v715_v53 = vmul.f32 %v713_v50, %v2259_v33 }
 0x861   :  { %v716_v56 = vsub.f32 %v715_v53, %v2265_v49  ;;  %v813_v20 = vmul.f32 %v1841_v47, %v812_v52 }
 0x863   :  { %719 = vrot.lane.b32.xlu0 %v716_v56, %s2107_s25  ;;  %v814_v59 = vadd.f32 %v1841_v47, %v813_v20  ;;  %v717_v18 = vmul.f32 %v716_v56, %v2427_v55  ;;  %v108_v55 = vld [vmem:[%s2704_s0 + $0x10] sm:$0xff] }
 0x865   :  { %v818_v2 = vsel %vm817_vm4, %v1841_v47, %v814_v59 }
 0x866   :  { %v823_v15 = vsel %vm820_vm5, %v822_v1, %v818_v2 }
 0x867   :  { %v825_v8 = vmul.f32 %v823_v15, %v2259_v33 }
 0x869   :  { %v826_v10 = vsub.f32 %v825_v8, %v2265_v49 }
 0x86b   :  { %832 = vrot.lane.b32.xlu1 %v826_v10, %s2107_s25  ;;  %v830_v24 = vmul.f32 %v828_v23, %v826_v10 }
 0x8d5   :  { %v720_v12 = vpop.permute.xlu0 %719 }
 0x8d6   :  { %v722_v13 = vmul.f32 %v720_v12, %v716_v56 }
 0x8d8   :  { %724 = vrot.lane.b32.xlu2 %v722_v13, %s2104_s4 }
 0x8dd   :  { %v833_v16 = vpop.permute.xlu1 %832 }
 0x8de   :  { %v835_v17 = vmul.f32 %v833_v16, %v826_v10 }
 0x8e0   :  { %837 = vrot.lane.b32.xlu0 %v835_v17, %s2104_s4 }
 0x932   :  { %v725_v19 = vpop.permute.xlu2 %724 }
 0x933   :  { %v2468_v21 = vadd.f32 %v725_v19, %v717_v18 }
 0x935   :  { %1842 = vtanh.f32 %v2468_v21 }
 0x93b   :  { %v1843_v22 = vpop.eup %1842 }
 0x93c   :  { %730 = vrot.lane.b32.xlu1 %v1843_v22, %s2107_s25 }
 0x952   :  { %v838_v31 = vpop.permute.xlu0 %837 }
 0x953   :  { %v2473_v34 = vadd.f32 %v838_v31, %v830_v24 }
 0x955   :  { %1844 = vtanh.f32 %v2473_v34 }
 0x95b   :  { %v1845_v35 = vpop.eup %1844 }
 0x95c   :  { %843 = vrot.lane.b32.xlu2 %v1845_v35, %s2107_s25 }
 0x964   :  { %119 = vperm.xlu2 %1799, %v108_v55  }
 0x9ae   :  { %v731_v36 = vpop.permute.xlu1 %730 }
 0x9af   :  { %v733_v37 = vmul.f32 %v731_v36, %v716_v56 }
 0x9b1   :  { %735 = vrot.lane.b32.xlu0 %v733_v37, %s2104_s4 }
 0x9b6   :  { %v844_v38 = vpop.permute.xlu2 %843 }
 0x9b7   :  { %v846_v51 = vmul.f32 %v844_v38, %v826_v10 }
 0x9b9   :  { %v848_v40 = vrot.slane %v846_v51, 4 }
 0x9bb   :  { %849 = vrot.lane.b32.xlu1 %v848_v40, %s2104_s4 }
 0x9be   :  { %v120_v32 = vpop.permute.xlu2 %119 }
 0x9bf   :  { %vm126_vm6 = vcmp.eq.s32.totalorder %v120_v32, %v2234_v25 }
 0x9c0   :  { %1730 = vmatmul.msk.f32.gmra.mxu0 %vm126_vm6, %v2105_v27 }
 0xa23   :  { %v736_v41 = vpop.permute.xlu0 %735 }
 0xa24   :  { %1751 = vmatmul.msk.f32.vlgmr.msrb.gmra.mxu3 %vm220_vm0, %v736_v41  ;;  %1752 = vmatmul.msk.f32.vlgmr.msra.gmra.mxu1 %vm220_vm0, %v736_v41 }
 0xa25   :  { %972 = vmatpush.msrb.mxu3 %v2201_v6  ;;  %1040 = vmatpush.msra.mxu1 %v2275_v60 }
 0xa27   :  { %973 = vmatpush.msrb.mxu3 %v2206_v7  ;;  %1041 = vmatpush.msra.mxu1 %v2277_v61 }
 0xa29   :  { %974 = vmatpush.msrb.mxu3 %v2212_v9  ;;  %1042 = vmatpush.msra.mxu1 %v2282_v63 }
 0xa2b   :  { %975 = vmatpush.msrb.mxu3 %v2218_v11  ;;  %1043 = vmatpush.msra.mxu1 %v2287_v0 }
 0xa2d   :  { %v850_v42 = vpop.permute.xlu1 %849 }
 0xa2e   :  { %1755 = vmatmul.msk.f32.vlgmr.msra.gmra.mxu3 %vm220_vm0, %v850_v42 }
 0xa2f   :  { %1127 = vmatpush.msra.mxu3 %v2280_v62 }
 0xa31   :  { %1128 = vmatpush.msra.mxu3 %v2296_v3 }
 0xa33   :  { %1129 = vmatpush.msra.mxu3 %v2298_v4 }
 0xa35   :  { %1130 = vmatpush.msra.mxu3 %v2302_v5 }
 0xa36   :  { %1759 = vmatmul.msk.f32.vlgmr.msrb.gmra.mxu3 %vm220_vm0, %v850_v42 }
 0xa37   :  { %1306 = vmatpush.msrb.mxu3 %v2280_v62 }
 0xa39   :  { %1307 = vmatpush.msrb.mxu3 %v2296_v3 }
 0xa3b   :  { %1308 = vmatpush.msrb.mxu3 %v2298_v4 }
 0xa3d   :  { %1309 = vmatpush.msrb.mxu3 %v2302_v5  ;;  %v179_v44 = vpop.f32.mrf.mxu0 }
 0xa3e   :  { %v2509_v62 = vadd.f32 %v2247_v28, %v179_v44 }
 0xaa1   :  { %v778_v9 = vpop.f32.mrf.mxu1 }
 0xaa7   :  { %v756_v6 = vpop.f32.mrf.mxu3 }
 0xaa8   :  { %v757_v7 = vadd.f32 %v2402_v39, %v756_v6 }
 0xaaa   :  { %760 = vst.msk [vmem:[#allocation10 + $0x8] sm:$0xf] %vm405_vm3, %v757_v7 }
 0xab1   :  { %v870_v11 = vpop.f32.mrf.mxu3 }
 0xab2   :  { %v871_v43 = vadd.f32 %v870_v11, %v778_v9  ;;  %v109_v9 = vld [vmem:[%s2704_s0 + $0x18] sm:$0xff]  ;;  %v1004_v11 = vrot.slane %v2473_v34, 4 }
 0xab4   :  { %v873_v47 = vadd.f32 %v2325_v14, %v871_v43 }
 0xab6   :  { %v874_v45 = vmul.f32 %v873_v47, %v2259_v33 }
 0xab8   :  { %v1756_v3 = vmul.f32 -1.442695, %v874_v45 }
 0xab9   :  { %v977_v4 = vpop.f32.mrf.mxu3 }
 0xaba   :  { %1846 = vpow2.f32 %v1756_v3  ;;  %v980_v5 = vadd.f32 %v977_v4, %v2509_v62 }
 0xabc   :  { %v981_v46 = vmul.f32 %v980_v5, %v2259_v33 }
 0xabe   :  { %v1760_v48 = vmul.f32 -1.442695, %v981_v46 }
 0xac0   :  { %v1847_v50 = vpop.eup %1846  ;;  %1848 = vpow2.f32 %v1760_v48  ;;  %v1900_v48 = vld [vmem:[%s2707_s3 + $0x18] sm:$0xff] }
 0xac1   :  { %v878_v52 = vadd.f32 1.0, %v1847_v50  ;;  %v1901_v50 = vld [vmem:[%s2707_s3 + $0x10] sm:$0xff] }
 0xac3   :  { %1850 = vrcp.f32 %v878_v52  ;;  %v890_v28 = vand.u32 2147483648, %v878_v52  ;;  %v888_v1 = vand.u32 2147483647, %v878_v52  ;;  %vm884_vm8 = vweird.f32 %v878_v52 }
 0xac5   :  { %v891_v10 = vor.u32 1.1754944e-38, %v890_v28  ;;  %vm889_vm10 = vcmp.eq.f32.partialorder %v888_v1, 8.507059e+37 }
 0xac6   :  { %v1849_v53 = vpop.eup %1848 }
 0xac7   :  { %v985_v54 = vadd.f32 1.0, %v1849_v53 }
 0xac9   :  { %v1851_v56 = vpop.eup %1850  ;;  %1852 = vrcp.f32 %v985_v54  ;;  %v997_v17 = vand.u32 2147483648, %v985_v54  ;;  %v995_v22 = vand.u32 2147483647, %v985_v54  ;;  %vm991_vm12 = vweird.f32 %v985_v54 }
 0xaca   :  { %v880_v20 = vmul.f32 %v1851_v56, %v878_v52  ;;  %vm885_vm7 = vweird.f32 %v1851_v56  ;;  %v1902_v52 = vld [vmem:[%s2707_s3 + $0x8] sm:$0xff] }
 0xacb   :  { %vm886_vm9 = vmor %vm884_vm8, %vm885_vm7  ;;  %v998_v31 = vor.u32 1.1754944e-38, %v997_v17  ;;  %vm996_vm14 = vcmp.eq.f32.partialorder %v995_v22, 8.507059e+37 }
 0xacc   :  { %v881_v57 = vsub.f32 1.0, %v880_v20 }
 0xace   :  { %v882_v59 = vmul.f32 %v1851_v56, %v881_v57 }
 0xacf   :  { %v1853_v2 = vpop.eup %1852 }
 0xad0   :  { %v987_v15 = vmul.f32 %v1853_v2, %v985_v54  ;;  %v883_v8 = vadd.f32 %v1851_v56, %v882_v59  ;;  %vm992_vm11 = vweird.f32 %v1853_v2 }
 0xad1   :  { %vm993_vm13 = vmor %vm991_vm12, %vm992_vm11 }
 0xad2   :  { %v988_v12 = vsub.f32 1.0, %v987_v15  ;;  %v887_v13 = vsel %vm886_vm9, %v1851_v56, %v883_v8 }
 0xad3   :  { %v892_v16 = vsel %vm889_vm10, %v891_v10, %v887_v13 }
 0xad4   :  { %v894_v18 = vmul.f32 %v892_v16, %v2259_v33  ;;  %v989_v19 = vmul.f32 %v1853_v2, %v988_v12 }
 0xad6   :  { %v895_v23 = vsub.f32 %v894_v18, %v2265_v49  ;;  %v990_v24 = vadd.f32 %v1853_v2, %v989_v19 }
 0xad8   :  { %898 = vrot.lane.b32.xlu0 %v895_v23, %s2107_s25  ;;  %v994_v35 = vsel %vm993_vm13, %v1853_v2, %v990_v24  ;;  %v896_v41 = vmul.f32 %v895_v23, %v2468_v21 }
 0xad9   :  { %v999_v55 = vsel %vm996_vm14, %v998_v31, %v994_v35 }
 0xada   :  { %v1001_v36 = vmul.f32 %v999_v55, %v2259_v33 }
 0xadc   :  { %v1002_v37 = vsub.f32 %v1001_v36, %v2265_v49 }
 0xade   :  { %1008 = vrot.lane.b32.xlu1 %v1002_v37, %s2107_s25  ;;  %v1006_v43 = vmul.f32 %v1004_v11, %v1002_v37 }
 0xb4a   :  { %v899_v38 = vpop.permute.xlu0 %898 }
 0xb4b   :  { %v901_v51 = vmul.f32 %v899_v38, %v895_v23 }
 0xb4d   :  { %903 = vrot.lane.b32.xlu2 %v901_v51, %s2104_s4 }
 0xb50   :  { %v1009_v40 = vpop.permute.xlu1 %1008 }
 0xb51   :  { %v1011_v32 = vmul.f32 %v1009_v40, %v1002_v37 }
 0xb53   :  { %1013 = vrot.lane.b32.xlu0 %v1011_v32, %s2104_s4 }
 0xba7   :  { %v904_v42 = vpop.permute.xlu2 %903 }
 0xba8   :  { %v2522_v6 = vadd.f32 %v904_v42, %v896_v41 }
 0xbaa   :  { %1854 = vtanh.f32 %v2522_v6 }
 0xbb0   :  { %v1855_v7 = vpop.eup %1854 }
 0xbb1   :  { %909 = vrot.lane.b32.xlu1 %v1855_v7, %s2107_s25 }
 0xbb9   :  { %122 = vperm.xlu1 %1800, %v109_v9  }
 0xbc5   :  { %v1014_v44 = vpop.permute.xlu0 %1013 }
 0xbc6   :  { %v2530_v47 = vadd.f32 %v1014_v44, %v1006_v43 }
 0xbc8   :  { %1856 = vtanh.f32 %v2530_v47 }
 0xbce   :  { %v1857_v21 = vpop.eup %1856 }
 0xbcf   :  { %1019 = vrot.lane.b32.xlu2 %v1857_v21, %s2107_s25 }
 0xc23   :  { %v910_v45 = vpop.permute.xlu1 %909 }
 0xc24   :  { %v912_v3 = vmul.f32 %v910_v45, %v895_v23 }
 0xc26   :  { %914 = vrot.lane.b32.xlu0 %v912_v3, %s2104_s4 }
 0xc29   :  { %v1020_v4 = vpop.permute.xlu2 %1019 }
 0xc2a   :  { %v1022_v5 = vmul.f32 %v1020_v4, %v1002_v37  ;;  %v1182_v4 = vrot.slane %v2530_v47, 4 }
 0xc2b   :  { %v123_v46 = vpop.permute.xlu1 %122 }
 0xc2c   :  { %1024 = vrot.lane.b32.xlu2 %v1022_v5, %s2104_s4  ;;  %vm127_vm15 = vcmp.eq.s32.totalorder %v123_v46, %v2234_v25  ;;  %v1903_v25 = vld [vmem:[%s2707_s3] sm:$0xff] }
 0xc2d   :  { %1731 = vmatmul.msk.f32.gmra.mxu0 %vm127_vm15, %v2105_v27 }
 0xc86   :  { %v1025_v34 = vpop.permute.xlu2 %1024 }
 0xc87   :  { %1765 = vmatmul.msk.f32.vlgmr.msrb.gmra.mxu0 %vm220_vm0, %v1025_v34 }
 0xc88   :  { %1501 = vmatpush.msrb.mxu0 %v1900_v48 }
 0xc8a   :  { %1502 = vmatpush.msrb.mxu0 %v1901_v50 }
 0xc8c   :  { %1503 = vmatpush.msrb.mxu0 %v1902_v52 }
 0xc8e   :  { %1504 = vmatpush.msrb.mxu0 %v1903_v25 }
 0xc98   :  { %v915_v27 = vpop.permute.xlu0 %914 }
 0xc99   :  { %1757 = vmatmul.msk.f32.vlgmr.msrb.gmra.mxu1 %vm220_vm0, %v915_v27  ;;  %1758 = vmatmul.msk.f32.vlgmr.msrb.gmra.mxu2 %vm220_vm0, %v915_v27 }
 0xc9a   :  { %1219 = vmatpush.msrb.mxu1 %v2275_v60  ;;  %1284 = vmatpush.msrb.mxu2 %v2352_v58 }
 0xc9c   :  { %1220 = vmatpush.msrb.mxu1 %v2277_v61  ;;  %1285 = vmatpush.msrb.mxu2 %v2354_v26 }
 0xc9e   :  { %1221 = vmatpush.msrb.mxu1 %v2282_v63  ;;  %1286 = vmatpush.msrb.mxu2 %v2358_v29 }
 0xca0   :  { %1222 = vmatpush.msrb.mxu1 %v2287_v0  ;;  %1287 = vmatpush.msrb.mxu2 %v2363_v30 }
 0xca1   :  { %1761 = vmatmul.msk.f32.vlgmr.msra.gmra.mxu1 %vm220_vm0, %v1025_v34 }
 0xca2   :  { %1394 = vmatpush.msra.mxu1 %v2275_v60 }
 0xca4   :  { %1395 = vmatpush.msra.mxu1 %v2277_v61 }
 0xca6   :  { %1396 = vmatpush.msra.mxu1 %v2282_v63 }
 0xca8   :  { %1397 = vmatpush.msra.mxu1 %v2287_v0 }
 0xcaa   :  { %v2566_v53 = vpop.f32.mrf.mxu0 }
 0xd04   :  { %v1152_v54 = vpop.f32.mrf.mxu0 }
 0xd05   :  { %v1156_v56 = vrot.slane %v1152_v54, 4 }
 0xd07   :  { %v1158_v20 = vadd.f32 %v1156_v56, %v2509_v62 }
 0xd09   :  { %v1159_v57 = vmul.f32 %v1158_v20, %v2259_v33 }
 0xd0b   :  { %v1766_v28 = vmul.f32 -1.442695, %v1159_v57 }
 0xd0d   :  { %1858 = vpow2.f32 %v1766_v28  ;;  %v1904_v28 = vld [vmem:[#allocation5 + $0x18] sm:$0xff] }
 0xd13   :  { %v1859_v59 = vpop.eup %1858 }
 0xd14   :  { %v1163_v1 = vadd.f32 1.0, %v1859_v59  ;;  %v1905_v59 = vld [vmem:[#allocation5 + $0x10] sm:$0xff] }
 0xd16   :  { %1860 = vrcp.f32 %v1163_v1  ;;  %v935_v60 = vpop.f32.mrf.mxu1  ;;  %v1175_v12 = vand.u32 2147483648, %v1163_v1  ;;  %v1173_v16 = vand.u32 2147483647, %v1163_v1  ;;  %vm1169_vm2 = vweird.f32 %v1163_v1 }
 0xd17   :  { %v936_v61 = vadd.f32 %v2402_v39, %v935_v60  ;;  %v1907_v60 = vld [vmem:[#allocation5] sm:$0xff] }
 0xd18   :  { %v1176_v19 = vor.u32 1.1754944e-38, %v1175_v12  ;;  %vm1174_vm5 = vcmp.eq.f32.partialorder %v1173_v16, 8.507059e+37 }
 0xd19   :  { %939 = vst.msk [vmem:[#allocation10 + $0xc] sm:$0xf] %vm405_vm3, %v936_v61 }
 0xd1c   :  { %v1861_v63 = vpop.eup %1860  ;;  %v957_v2 = vpop.f32.mrf.mxu2 }
 0xd1d   :  { %v1165_v0 = vmul.f32 %v1861_v63, %v1163_v1  ;;  %vm1170_vm1 = vweird.f32 %v1861_v63  ;;  %v1906_v1 = vld [vmem:[#allocation5 + $0x8] sm:$0xff] }
 0xd1e   :  { %v1045_v15 = vpop.f32.mrf.mxu1  ;;  %vm1171_vm4 = vmor %vm1169_vm2, %vm1170_vm1 }
 0xd1f   :  { %v1166_v8 = vsub.f32 1.0, %v1165_v0  ;;  %v1046_v10 = vadd.f32 %v1045_v15, %v957_v2  ;;  %v1909_v0 = vld [vmem:[#allocation7 + $0x10] sm:$0xff]  ;;  %v1910_v2 = vld [vmem:[#allocation7 + $0x8] sm:$0xff]  ;;  %v1911_v15 = vld [vmem:[#allocation7] sm:$0xff] }
 0xd21   :  { %v1048_v62 = vadd.f32 %v2325_v14, %v1046_v10  ;;  %v1167_v13 = vmul.f32 %v1861_v63, %v1166_v8  ;;  %v1912_v8 = vld [vmem:[%s2706_s2] ss:$0 sm:$0xff] }
 0xd22   :  { %v2606_v10 = vadd.f32 %v1912_v8, %v2566_v53  ;;  %v1914_v8 = vld [vmem:[#allocation8 + $0x18] sm:$0xff] }
 0xd23   :  { %v1049_v17 = vmul.f32 %v1048_v62, %v2259_v33  ;;  %v1168_v18 = vadd.f32 %v1861_v63, %v1167_v13 }
 0xd25   :  { %v1762_v22 = vmul.f32 -1.442695, %v1049_v17  ;;  %v1172_v23 = vsel %vm1171_vm4, %v1861_v63, %v1168_v18  ;;  %v1908_v63 = vld [vmem:[#allocation7 + $0x18] sm:$0xff] }
 0xd26   :  { %v1177_v24 = vsel %vm1174_vm5, %v1176_v19, %v1172_v23 }
 0xd27   :  { %1862 = vpow2.f32 %v1762_v22  ;;  %v1179_v31 = vmul.f32 %v1177_v24, %v2259_v33 }
 0xd29   :  { %v1180_v35 = vsub.f32 %v1179_v31, %v2265_v49 }
 0xd2b   :  { %1186 = vrot.lane.b32.xlu1 %v1180_v35, %s2107_s25  ;;  %v1184_v5 = vmul.f32 %v1182_v4, %v1180_v35 }
 0xd2d   :  { %v1863_v14 = vpop.eup %1862 }
 0xd2e   :  { %v1053_v55 = vadd.f32 1.0, %v1863_v14 }
 0xd30   :  { %1864 = vrcp.f32 %v1053_v55  ;;  %v1065_v51 = vand.u32 2147483648, %v1053_v55  ;;  %v1063_v32 = vand.u32 2147483647, %v1053_v55  ;;  %vm1059_vm7 = vweird.f32 %v1053_v55 }
 0xd32   :  { %v1066_v42 = vor.u32 1.1754944e-38, %v1065_v51  ;;  %vm1064_vm9 = vcmp.eq.f32.partialorder %v1063_v32, 8.507059e+37 }
 0xd36   :  { %v1865_v36 = vpop.eup %1864 }
 0xd37   :  { %v1055_v37 = vmul.f32 %v1865_v36, %v1053_v55  ;;  %vm1060_vm6 = vweird.f32 %v1865_v36 }
 0xd38   :  { %vm1061_vm8 = vmor %vm1059_vm7, %vm1060_vm6 }
 0xd39   :  { %v1056_v38 = vsub.f32 1.0, %v1055_v37 }
 0xd3b   :  { %v1057_v40 = vmul.f32 %v1865_v36, %v1056_v38  ;;  %v2615_v38 = vld [vmem:[%s2710_s6] ss:$0 sm:$0xff] }
 0xd3d   :  { %v1058_v41 = vadd.f32 %v1865_v36, %v1057_v40 }
 0xd3f   :  { %v1062_v7 = vsel %vm1061_vm8, %v1865_v36, %v1058_v41 }
 0xd40   :  { %v1067_v9 = vsel %vm1064_vm9, %v1066_v42, %v1062_v7 }
 0xd41   :  { %v1069_v11 = vmul.f32 %v1067_v9, %v2259_v33 }
 0xd43   :  { %v1070_v43 = vsub.f32 %v1069_v11, %v2265_v49 }
 0xd45   :  { %1073 = vrot.lane.b32.xlu0 %v1070_v43, %s2107_s25  ;;  %v1071_v48 = vmul.f32 %v1070_v43, %v2522_v6 }
 0xd9d   :  { %v1187_v44 = vpop.permute.xlu1 %1186 }
 0xd9e   :  { %v1189_v21 = vmul.f32 %v1187_v44, %v1180_v35 }
 0xda0   :  { %1191 = vrot.lane.b32.xlu0 %v1189_v21, %s2104_s4 }
 0xdb7   :  { %v1074_v45 = vpop.permute.xlu0 %1073 }
 0xdb8   :  { %v1076_v3 = vmul.f32 %v1074_v45, %v1070_v43 }
 0xdba   :  { %1078 = vrot.lane.b32.xlu2 %v1076_v3, %s2104_s4 }
 0xe12   :  { %v1192_v46 = vpop.permute.xlu0 %1191 }
 0xe13   :  { %v2583_v34 = vadd.f32 %v1192_v46, %v1184_v5 }
 0xe14   :  { %v1079_v50 = vpop.permute.xlu2 %1078 }
 0xe15   :  { %1866 = vtanh.f32 %v2583_v34  ;;  %v2587_v52 = vadd.f32 %v1079_v50, %v1071_v48 }
 0xe17   :  { %1868 = vtanh.f32 %v2587_v52 }
 0xe1b   :  { %v1867_v25 = vpop.eup %1866 }
 0xe1c   :  { %1197 = vrot.lane.b32.xlu2 %v1867_v25, %s2107_s25 }
 0xe1d   :  { %v1869_v27 = vpop.eup %1868 }
 0xe1e   :  { %1084 = vrot.lane.b32.xlu1 %v1869_v27, %s2107_s25 }
 0xe76   :  { %v1198_v47 = vpop.permute.xlu2 %1197 }
 0xe77   :  { %v1200_v54 = vmul.f32 %v1198_v47, %v1180_v35 }
 0xe79   :  { %v1202_v56 = vrot.slane %v1200_v54, 4 }
 0xe7b   :  { %1203 = vrot.lane.b32.xlu1 %v1202_v56, %s2104_s4  ;;  %v1358_v56 = vrot.slane %v2583_v34, 4 }
 0xe90   :  { %v1085_v20 = vpop.permute.xlu1 %1084 }
 0xe91   :  { %v1087_v6 = vmul.f32 %v1085_v20, %v1070_v43 }
 0xe93   :  { %1089 = vrot.lane.b32.xlu0 %v1087_v6, %s2104_s4 }
 0xeed   :  { %v1204_v57 = vpop.permute.xlu1 %1203 }
 0xeee   :  { %1767 = vmatmul.msk.f32.vlgmr.msrb.gmra.mxu1 %vm220_vm0, %v1204_v57  ;;  %1771 = vmatmul.msk.f32.vlgmr.msra.gmra.mxu0 %vm220_vm0, %v1204_v57 }
 0xeef   :  { %1573 = vmatpush.msrb.mxu1 %v1904_v28 }
 0xef1   :  { %1574 = vmatpush.msrb.mxu1 %v1905_v59 }
 0xef3   :  { %1575 = vmatpush.msrb.mxu1 %v1906_v1 }
 0xef5   :  { %1576 = vmatpush.msrb.mxu1 %v1907_v60 }
 0xf05   :  { %v1090_v61 = vpop.permute.xlu0 %1089 }
 0xf06   :  { %1763 = vmatmul.msk.f32.vlgmr.msra.gmra.mxu2 %vm220_vm0, %v1090_v61  ;;  %1764 = vmatmul.msk.f32.vlgmr.msra.gmra.mxu3 %vm220_vm0, %v1090_v61 }
 0xf07   :  { %1481 = vmatpush.msra.mxu3 %v1908_v63  ;;  %1459 = vmatpush.msra.mxu2 %v2352_v58 }
 0xf09   :  { %1482 = vmatpush.msra.mxu3 %v1909_v0  ;;  %1460 = vmatpush.msra.mxu2 %v2354_v26 }
 0xf0b   :  { %1483 = vmatpush.msra.mxu3 %v1910_v2  ;;  %1461 = vmatpush.msra.mxu2 %v2358_v29 }
 0xf0d   :  { %1484 = vmatpush.msra.mxu3 %v1911_v15  ;;  %1462 = vmatpush.msra.mxu2 %v2363_v30 }
 0xf6b   :  { %v1331_v58 = vpop.f32.mrf.mxu0  ;;  %v1224_v23 = vpop.f32.mrf.mxu1 }
 0xf6c   :  { %v1334_v12 = vadd.f32 %v1331_v58, %v2606_v10  ;;  %v1915_v58 = vld [vmem:[#allocation8 + $0x10] sm:$0xff] }
 0xf6e   :  { %v1335_v26 = vmul.f32 %v1334_v12, %v2259_v33  ;;  %v1916_v12 = vld [vmem:[#allocation8 + $0x8] sm:$0xff] }
 0xf70   :  { %v1772_v62 = vmul.f32 -1.442695, %v1335_v26  ;;  %v1917_v26 = vld [vmem:[#allocation8] sm:$0xff] }
 0xf72   :  { %1870 = vpow2.f32 %v1772_v62 }
 0xf78   :  { %v1871_v13 = vpop.eup %1870 }
 0xf79   :  { %v1339_v29 = vadd.f32 1.0, %v1871_v13 }
 0xf7b   :  { %1872 = vrcp.f32 %v1339_v29  ;;  %v1351_v18 = vand.u32 2147483648, %v1339_v29  ;;  %v1349_v22 = vand.u32 2147483647, %v1339_v29  ;;  %vm1345_vm11 = vweird.f32 %v1339_v29 }
 0xf7d   :  { %v1352_v35 = vor.u32 1.1754944e-38, %v1351_v18  ;;  %vm1350_vm13 = vcmp.eq.f32.partialorder %v1349_v22, 8.507059e+37 }
 0xf81   :  { %v1873_v16 = vpop.eup %1872 }
 0xf82   :  { %v1341_v17 = vmul.f32 %v1873_v16, %v1339_v29  ;;  %vm1346_vm10 = vweird.f32 %v1873_v16 }
 0xf83   :  { %vm1347_vm12 = vmor %vm1345_vm11, %vm1346_vm10 }
 0xf84   :  { %v1342_v30 = vsub.f32 1.0, %v1341_v17 }
 0xf86   :  { %v1343_v19 = vmul.f32 %v1873_v16, %v1342_v30 }
 0xf88   :  { %v1344_v53 = vadd.f32 %v1873_v16, %v1343_v19 }
 0xf89   :  { %v1110_v24 = vpop.f32.mrf.mxu2  ;;  %v1132_v31 = vpop.f32.mrf.mxu3 }
 0xf8a   :  { %v1111_v14 = vadd.f32 %v2402_v39, %v1110_v24  ;;  %v1225_v55 = vadd.f32 %v1224_v23, %v1132_v31  ;;  %v1348_v36 = vsel %vm1347_vm12, %v1873_v16, %v1344_v53  ;;  %v2648_v23 = vld [vmem:[%s2712_s8] ss:$0 sm:$0xff]  ;;  %s2108_s8 = smov 96  }
 0xf8b   :  { %v1353_v37 = vsel %vm1350_vm13, %v1352_v35, %v1348_v36 }
 0xf8c   :  { %1114 = vst.msk [vmem:[#allocation10 + $0x10] sm:$0xf] %vm405_vm3, %v1111_v14  ;;  %v1227_v51 = vadd.f32 %v2615_v38, %v1225_v55  ;;  %v1355_v40 = vmul.f32 %v1353_v37, %v2259_v33 }
 0xf8e   :  { %v1228_v32 = vmul.f32 %v1227_v51, %v2259_v33  ;;  %v1356_v41 = vsub.f32 %v1355_v40, %v2265_v49 }
 0xf90   :  { %v1768_v39 = vmul.f32 -1.442695, %v1228_v32  ;;  %1362 = vrot.lane.b32.xlu0 %v1356_v41, %s2107_s25  ;;  %v1360_v20 = vmul.f32 %v1358_v56, %v1356_v41 }
 0xf92   :  { %1874 = vpow2.f32 %v1768_v39 }
 0xf98   :  { %v1875_v42 = vpop.eup %1874 }
 0xf99   :  { %v1232_v7 = vadd.f32 1.0, %v1875_v42 }
 0xf9b   :  { %1876 = vrcp.f32 %v1232_v7  ;;  %v1244_v44 = vand.u32 2147483648, %v1232_v7  ;;  %v1242_v45 = vand.u32 2147483647, %v1232_v7  ;;  %vm1238_vm15 = vweird.f32 %v1232_v7 }
 0xf9d   :  { %v1245_v4 = vor.u32 1.1754944e-38, %v1244_v44  ;;  %vm1243_vm2 = vcmp.eq.f32.partialorder %v1242_v45, 8.507059e+37 }
 0xfa1   :  { %v1877_v9 = vpop.eup %1876 }
 0xfa2   :  { %v1234_v11 = vmul.f32 %v1877_v9, %v1232_v7  ;;  %vm1239_vm14 = vweird.f32 %v1877_v9 }
 0xfa3   :  { %vm1240_vm1 = vmor %vm1238_vm15, %vm1239_vm14 }
 0xfa4   :  { %v1235_v43 = vsub.f32 1.0, %v1234_v11 }
 0xfa6   :  { %v1236_v21 = vmul.f32 %v1877_v9, %v1235_v43 }
 0xfa8   :  { %v1237_v3 = vadd.f32 %v1877_v9, %v1236_v21 }
 0xfaa   :  { %v1241_v5 = vsel %vm1240_vm1, %v1877_v9, %v1237_v3  ;;  %vm1651_vm1 = vcmask 261124  }
 0xfab   :  { %v1246_v46 = vsel %vm1243_vm2, %v1245_v4, %v1241_v5  ;;  %vm1655_vm2 = vcmask 257024  }
 0xfac   :  { %v1248_v48 = vmul.f32 %v1246_v46, %v2259_v33 }
 0xfae   :  { %v1249_v50 = vsub.f32 %v1248_v48, %v2265_v49 }
 0xfb0   :  { %1252 = vrot.lane.b32.xlu2 %v1249_v50, %s2107_s25  ;;  %v1250_v59 = vmul.f32 %v1249_v50, %v2587_v52 }
0x1002   :  { %v1363_v25 = vpop.permute.xlu0 %1362 }
0x1003   :  { %v1365_v27 = vmul.f32 %v1363_v25, %v1356_v41 }
0x1005   :  { %1367 = vrot.lane.b32.xlu2 %v1365_v27, %s2104_s4 }
0x100a   :  { %v1253_v47 = vpop.permute.xlu2 %1252 }
0x100b   :  { %v1255_v54 = vmul.f32 %v1253_v47, %v1249_v50 }
0x100d   :  { %1257 = vrot.lane.b32.xlu1 %v1255_v54, %s2104_s4 }
0x105f   :  { %v1368_v6 = vpop.permute.xlu2 %1367 }
0x1060   :  { %v2628_v57 = vadd.f32 %v1368_v6, %v1360_v20 }
0x1062   :  { %1878 = vtanh.f32 %v2628_v57 }
0x1068   :  { %v1879_v28 = vpop.eup %1878 }
0x1069   :  { %1373 = vrot.lane.b32.xlu1 %v1879_v28, %s2107_s25 }
0x107f   :  { %v1258_v1 = vpop.permute.xlu1 %1257 }
0x1080   :  { %v2633_v60 = vadd.f32 %v1258_v1, %v1250_v59  ;;  %v1536_v59 = vrot.slane %v2628_v57, 4 }
0x1082   :  { %1880 = vtanh.f32 %v2633_v60 }
0x1088   :  { %v1881_v61 = vpop.eup %1880 }
0x1089   :  { %1263 = vrot.lane.b32.xlu0 %v1881_v61, %s2107_s25 }
0x10db   :  { %v1374_v34 = vpop.permute.xlu1 %1373 }
0x10dc   :  { %v1376_v63 = vmul.f32 %v1374_v34, %v1356_v41 }
0x10de   :  { %1378 = vrot.lane.b32.xlu0 %v1376_v63, %s2104_s4 }
0x10fb   :  { %v1264_v0 = vpop.permute.xlu0 %1263 }
0x10fc   :  { %v1266_v2 = vmul.f32 %v1264_v0, %v1249_v50 }
0x10fe   :  { %1268 = vrot.lane.b32.xlu2 %v1266_v2, %s2104_s4 }
0x1150   :  { %v1379_v15 = vpop.permute.xlu0 %1378 }
0x1151   :  { %1773 = vmatmul.msk.f32.vlgmr.msra.gmra.mxu1 %vm220_vm0, %v1379_v15  ;;  %1777 = vmatmul.msk.f32.vlgmr.msrb.gmra.mxu0 %vm220_vm0, %v1379_v15 }
0x1158   :  { %v1269_v52 = vpop.permute.xlu2 %1268 }
0x1159   :  { %1769 = vmatmul.msk.f32.vlgmr.msrb.gmra.mxu2 %vm220_vm0, %v1269_v52  ;;  %1770 = vmatmul.msk.f32.vlgmr.msrb.gmra.mxu3 %vm220_vm0, %v1269_v52 }
0x115a   :  { %1638 = vmatpush.msrb.mxu2 %v1914_v8 }
0x115c   :  { %1639 = vmatpush.msrb.mxu2 %v1915_v58 }
0x115e   :  { %1640 = vmatpush.msrb.mxu2 %v1916_v12 }
0x1160   :  { %1641 = vmatpush.msrb.mxu2 %v1917_v26 }
0x11ce   :  { %v1506_v62 = vpop.f32.mrf.mxu0  ;;  %v1399_v30 = vpop.f32.mrf.mxu1 }
0x11cf   :  { %v1510_v13 = vrot.slane %v1506_v62, 4 }
0x11d1   :  { %v1512_v29 = vadd.f32 %v1510_v13, %v2606_v10 }
0x11d3   :  { %v1513_v16 = vmul.f32 %v1512_v29, %v2259_v33 }
0x11d5   :  { %v1778_v17 = vmul.f32 -1.442695, %v1513_v16 }
0x11d7   :  { %1882 = vpow2.f32 %v1778_v17 }
0x11dc   :  { %v1289_v18 = vpop.f32.mrf.mxu2  ;;  %v1311_v19 = vpop.f32.mrf.mxu3 }
0x11dd   :  { %v1883_v22 = vpop.eup %1882  ;;  %v1290_v53 = vadd.f32 %v2648_v23, %v1289_v18  ;;  %v1400_v24 = vadd.f32 %v1399_v30, %v1311_v19 }
0x11de   :  { %v1517_v31 = vadd.f32 1.0, %v1883_v22 }
0x11df   :  { %1293 = vst.msk [vmem:[#allocation10 + $0x14] sm:$0xf] %vm405_vm3, %v1290_v53  ;;  %v1402_v10 = vadd.f32 %v2615_v38, %v1400_v24 }
0x11e0   :  { %1884 = vrcp.f32 %v1517_v31  ;;  %v1529_v51 = vand.u32 2147483648, %v1517_v31  ;;  %v1527_v41 = vand.u32 2147483647, %v1517_v31  ;;  %vm1523_vm5 = vweird.f32 %v1517_v31 }
0x11e1   :  { %v1403_v35 = vmul.f32 %v1402_v10, %v2259_v33 }
0x11e2   :  { %v1530_v7 = vor.u32 1.1754944e-38, %v1529_v51  ;;  %vm1528_vm7 = vcmp.eq.f32.partialorder %v1527_v41, 8.507059e+37 }
0x11e3   :  { %v1774_v14 = vmul.f32 -1.442695, %v1403_v35 }
0x11e5   :  { %1886 = vpow2.f32 %v1774_v14 }
0x11e6   :  { %v1885_v55 = vpop.eup %1884 }
0x11e7   :  { %v1519_v36 = vmul.f32 %v1885_v55, %v1517_v31  ;;  %vm1524_vm4 = vweird.f32 %v1885_v55 }
0x11e8   :  { %vm1525_vm6 = vmor %vm1523_vm5, %vm1524_vm4 }
0x11e9   :  { %v1520_v37 = vsub.f32 1.0, %v1519_v36 }
0x11eb   :  { %v1887_v40 = vpop.eup %1886  ;;  %v1521_v32 = vmul.f32 %v1885_v55, %v1520_v37 }
0x11ec   :  { %v1407_v39 = vadd.f32 1.0, %v1887_v40 }
0x11ed   :  { %v1522_v42 = vadd.f32 %v1885_v55, %v1521_v32 }
0x11ee   :  { %1888 = vrcp.f32 %v1407_v39  ;;  %v1419_v4 = vand.u32 2147483648, %v1407_v39  ;;  %v1417_v46 = vand.u32 2147483647, %v1407_v39  ;;  %vm1413_vm9 = vweird.f32 %v1407_v39 }
0x11ef   :  { %v1526_v9 = vsel %vm1525_vm6, %v1885_v55, %v1522_v42 }
0x11f0   :  { %v1531_v11 = vsel %vm1528_vm7, %v1530_v7, %v1526_v9  ;;  %v1420_v50 = vor.u32 1.1754944e-38, %v1419_v4  ;;  %vm1418_vm11 = vcmp.eq.f32.partialorder %v1417_v46, 8.507059e+37 }
0x11f1   :  { %v1533_v43 = vmul.f32 %v1531_v11, %v2259_v33 }
0x11f3   :  { %v1534_v44 = vsub.f32 %v1533_v43, %v2265_v49 }
0x11f4   :  { %v1889_v21 = vpop.eup %1888 }
0x11f5   :  { %v1409_v45 = vmul.f32 %v1889_v21, %v1407_v39  ;;  %1540 = vrot.lane.b32.xlu2 %v1534_v44, %s2107_s25  ;;  %vm1414_vm8 = vweird.f32 %v1889_v21  ;;  %v1538_v1 = vmul.f32 %v1536_v59, %v1534_v44 }
0x11f6   :  { %vm1415_vm10 = vmor %vm1413_vm9, %vm1414_vm8 }
0x11f7   :  { %v1410_v3 = vsub.f32 1.0, %v1409_v45 }
0x11f9   :  { %v1411_v5 = vmul.f32 %v1889_v21, %v1410_v3 }
0x11fb   :  { %v1412_v48 = vadd.f32 %v1889_v21, %v1411_v5 }
0x11fd   :  { %v1416_v25 = vsel %vm1415_vm10, %v1889_v21, %v1412_v48 }
0x11fe   :  { %v1421_v27 = vsel %vm1418_vm11, %v1420_v50, %v1416_v25 }
0x11ff   :  { %v1423_v47 = vmul.f32 %v1421_v27, %v2259_v33 }
0x1201   :  { %v1424_v54 = vsub.f32 %v1423_v47, %v2265_v49 }
0x1203   :  { %1427 = vrot.lane.b32.xlu1 %v1424_v54, %s2107_s25  ;;  %v1425_v0 = vmul.f32 %v1424_v54, %v2633_v60 }
0x124f   :  { %v1541_v56 = vpop.permute.xlu2 %1540 }
0x1250   :  { %v1543_v20 = vmul.f32 %v1541_v56, %v1534_v44 }
0x1252   :  { %1545 = vrot.lane.b32.xlu1 %v1543_v20, %s2104_s4 }
0x1275   :  { %v1428_v6 = vpop.permute.xlu1 %1427 }
0x1276   :  { %v1430_v28 = vmul.f32 %v1428_v6, %v1424_v54 }
0x1278   :  { %1432 = vrot.lane.b32.xlu0 %v1430_v28, %s2104_s4 }
0x12c4   :  { %v1546_v61 = vpop.permute.xlu1 %1545 }
0x12c5   :  { %v2663_v34 = vadd.f32 %v1546_v61, %v1538_v1 }
0x12c7   :  { %1890 = vtanh.f32 %v2663_v34 }
0x12cd   :  { %v1891_v63 = vpop.eup %1890 }
0x12ce   :  { %1551 = vrot.lane.b32.xlu0 %v1891_v63, %s2107_s25 }
0x12ea   :  { %v1433_v2 = vpop.permute.xlu0 %1432 }
0x12eb   :  { %v1435_v15 = vadd.f32 %v1433_v2, %v1425_v0 }
0x12ed   :  { %1892 = vtanh.f32 %v1435_v15 }
0x12f3   :  { %v1893_v52 = vpop.eup %1892 }
0x12f4   :  { %1438 = vrot.lane.b32.xlu2 %v1893_v52, %s2107_s25 }
0x1340   :  { %v1552_v8 = vpop.permute.xlu0 %1551 }
0x1341   :  { %v1554_v58 = vmul.f32 %v1552_v8, %v1534_v44 }
0x1343   :  { %v1556_v57 = vrot.slane %v1554_v58, 4 }
0x1345   :  { %1557 = vrot.lane.b32.xlu2 %v1556_v57, %s2104_s4 }
0x134e   :  { %v1439_v12 = vpop.permute.xlu2 %1438 }
0x134f   :  { %v1441_v26 = vmul.f32 %v1439_v12, %v1424_v54 }
0x1351   :  { %1443 = vrot.lane.b32.xlu1 %v1441_v26, %s2104_s4 }
0x139f   :  { %v1558_v62 = vpop.permute.xlu2 %1557 }
0x13a0   :  { %1779 = vmatmul.msk.f32.vlgmr.msrb.gmra.mxu1 %vm220_vm0, %v1558_v62 }
0x13c3   :  { %v1444_v13 = vpop.permute.xlu1 %1443 }
0x13c4   :  { %1775 = vmatmul.msk.f32.vlgmr.msra.gmra.mxu2 %vm220_vm0, %v1444_v13  ;;  %1776 = vmatmul.msk.f32.vlgmr.msra.gmra.mxu3 %vm220_vm0, %v1444_v13 }
0x141d   :  { %v1578_v60 = vpop.f32.mrf.mxu1 }
0x1447   :  { %v1464_v29 = vpop.f32.mrf.mxu2  ;;  %v1486_v16 = vpop.f32.mrf.mxu3 }
0x1448   :  { %v1465_v17 = vadd.f32 %v2648_v23, %v1464_v29  ;;  %v1579_v30 = vadd.f32 %v1578_v60, %v1486_v16 }
0x144a   :  { %1468 = vst.msk [vmem:[#allocation10 + $0x18] sm:$0xf] %vm405_vm3, %v1465_v17  ;;  %v1581_v18 = vadd.f32 %v2615_v38, %v1579_v30 }
0x144c   :  { %v1582_v19 = vmul.f32 %v1581_v18, %v2259_v33 }
0x144e   :  { %v1780_v22 = vmul.f32 -1.442695, %v1582_v19 }
0x1450   :  { %1894 = vpow2.f32 %v1780_v22 }
0x1456   :  { %v1895_v53 = vpop.eup %1894 }
0x1457   :  { %v1586_v24 = vadd.f32 1.0, %v1895_v53 }
0x1459   :  { %1896 = vrcp.f32 %v1586_v24  ;;  %v1598_v14 = vand.u32 2147483648, %v1586_v24  ;;  %v1596_v36 = vand.u32 2147483647, %v1586_v24  ;;  %vm1592_vm13 = vweird.f32 %v1586_v24 }
0x145b   :  { %v1599_v51 = vor.u32 1.1754944e-38, %v1598_v14  ;;  %vm1597_vm15 = vcmp.eq.f32.partialorder %v1596_v36, 8.507059e+37 }
0x145f   :  { %v1897_v31 = vpop.eup %1896 }
0x1460   :  { %v1588_v10 = vmul.f32 %v1897_v31, %v1586_v24  ;;  %vm1593_vm12 = vweird.f32 %v1897_v31 }
0x1461   :  { %vm1594_vm14 = vmor %vm1592_vm13, %vm1593_vm12 }
0x1462   :  { %v1589_v35 = vsub.f32 1.0, %v1588_v10 }
0x1464   :  { %v1590_v55 = vmul.f32 %v1897_v31, %v1589_v35 }
0x1466   :  { %v1591_v37 = vadd.f32 %v1897_v31, %v1590_v55 }
0x1468   :  { %v1595_v40 = vsel %vm1594_vm14, %v1897_v31, %v1591_v37 }
0x1469   :  { %v1600_v38 = vsel %vm1597_vm15, %v1599_v51, %v1595_v40 }
0x146a   :  { %v1602_v32 = vmul.f32 %v1600_v38, %v2259_v33 }
0x146c   :  { %v1603_v41 = vsub.f32 %v1602_v32, %v2265_v49 }
0x146e   :  { %1606 = vrot.lane.b32.xlu0 %v1603_v41, %s2107_s25  ;;  %v1604_v7 = vmul.f32 %v1603_v41, %v1435_v15 }
0x14e0   :  { %v1607_v39 = vpop.permute.xlu0 %1606 }
0x14e1   :  { %v1609_v42 = vmul.f32 %v1607_v39, %v1603_v41 }
0x14e3   :  { %1611 = vrot.lane.b32.xlu1 %v1609_v42, %s2104_s4 }
0x14eb   :  { %1648 = vrot.lane.b32.xlu1 %v1554_v58, %s2104_s4 }
0x1555   :  { %v1612_v9 = vpop.permute.xlu1 %1611 }
0x1556   :  { %v1614_v11 = vadd.f32 %v1612_v9, %v1604_v7 }
0x1558   :  { %1898 = vtanh.f32 %v1614_v11 }
0x155d   :  { %v1649_v43 = vpop.permute.xlu1 %1648 }
0x155e   :  { %v1899_v44 = vpop.eup %1898  ;;  %1652 = vst.msk [vmem:[#allocation11 - $0x4] sm:$0xf0] %vm1651_vm1, %v1649_v43 }
0x155f   :  { %1617 = vrot.lane.b32.xlu2 %v1899_v44, %s2107_s25 }
0x1567   :  { %1658 = vrot.lane.b32.xlu2 %v2663_v34, %s2108_s8 }
0x15b9   :  { %v1618_v33 = vpop.permute.xlu2 %1617 }
0x15ba   :  { %v1620_v49 = vmul.f32 %v1618_v33, %v1603_v41 }
0x15bc   :  { %1622 = vrot.lane.b32.xlu0 %v1620_v49, %s2104_s4 }
0x15c1   :  { %v1659_v21 = vpop.permute.xlu2 %1658 }
0x15c2   :  { %1661 = vst.msk [vmem:[#allocation13 - $0x4] sm:$0xf0] %vm1651_vm1, %v1659_v21 }
0x15c4   :  { %1663 = vrot.lane.b32.xlu0 %v1614_v11, %s2108_s8 }
0x162e   :  { %v1623_v45 = vpop.permute.xlu0 %1622 }
0x162f   :  { %1656 = vst.msk [vmem:[#allocation11 + $0x4] sm:$0xf] %vm1655_vm2, %v1623_v45  ;;  %1781 = vmatmul.msk.f32.vlgmr.msrb.gmra.mxu2 %vm220_vm0, %v1623_v45 }
0x1630   :  { %1693 = dma.vmem_to_hbm [thread:$0]  %s1686_s9, 128, %s1688_s28, [#allocation12], %s2107_s25, %s2107_s25, %s2110_s29  }
0x1636   :  { %v1664_v3 = vpop.permute.xlu0 %1663 }
0x1637   :  { %1667 = vst.msk [vmem:[#allocation13 + $0x4] sm:$0xf] %vm1655_vm2, %v1664_v3 }
0x1638   :  { %1706 = dma.vmem_to_hbm [thread:$0]  %s1699_s16, 128, %s1701_s14, [#allocation12], %s2107_s25, %s2107_s25, %s2110_s29  }
0x16b2   :  { %v1643_v4 = vpop.f32.mrf.mxu2 }
0x16b3   :  { %v1644_v5 = vadd.f32 %v2648_v23, %v1643_v4 }
0x16b5   :  { %1647 = vst.msk [vmem:[#allocation10 + $0x1c] sm:$0xf] %vm405_vm3, %v1644_v5 }
0x16b6   :  { %1680 = dma.vmem_to_hbm [thread:$0]  %s1673_s17, 512, %s1675_s19, [#allocation4], %s2107_s25, %s2107_s25, %s2110_s29  }
0x16b7   :  { %2093 = dma.done.wait [#allocation4], 512  }
0x16b8   :  { %2094 = vsyncadd [#allocation4], 4294966784 }
0x16b9   :  { %2095 = dma.done.wait [#allocation12], 256  }
0x16ba   :  { %2096 = vsyncadd [#allocation12], 4294967040 }
0x16bb   :  { %1719 = vsyncpa [#allocation3], 1 }
0x16bc   :  { %1720 = vsyncpa [#allocation6], 1 }
0x16bd   :  { %1721 = vsyncpa [#allocation9], 1 }
0x16be   :  { %1722 = vsyncpa [#allocation4], 1 }
0x16bf   :  { %1723 = vsyncpa [#allocation12], 1 }

</bundles_post_ra>
